<compile_context>
chip_gen: v6e
topology: v6e:2x2x1
jax: 0.10.0
libtpu: 0.0.40
codegen_flags: <defaults>
</compile_context>

<pallas_src>
import functools

import jax
import jax.numpy as jnp
from jax.experimental import pallas as pl
from jax.experimental.pallas import tpu as pltpu


def _round_up(x, m):
    return (x + m - 1) // m * m


def _cdiv(a, b):
    return -(-a // b)


def _choose_tile_rows(n, requested):
    """Rows per grid step: multiple of 8, <= requested.

    Prefers >= 2 grid steps (so input/output DMAs pipeline and the "parallel"
    axis can shard across v7x's two TensorCores) and nudges the step count to
    be even, while keeping padded rows small.  All args are static Python ints.
    """
    t = max(8, min(_round_up(requested, 8), _round_up(n, 8)))
    if n > 8:
        # ensure at least two grid steps
        t = min(t, _round_up(_cdiv(n, 2), 8))
        # nudge to an even step count (v7x: 2 TCs on the parallel axis)
        steps = _cdiv(n, t)
        if steps % 2:
            t = max(8, _round_up(_cdiv(n, steps + 1), 8))
    return t


def _two_scale_mix_kernel(
    x_ref,                     # (T, Cin_pad) bf16 rows = [m | s (pre-LN) | 0-pad]
    g1_ref, bt1_ref,           # (1, Cin_pad) f32 LayerNorm(in_dim_s//4) affine on s lanes
    w12_ref, b12_ref,          # (Cin_pad, 1024) bf16 folded W1@W2, (1, 1024) f32 folded bias
    g2_ref, bt2_ref,           # (1, 1024) f32 LayerNorm(1024) affine
    wc_ref, bc_ref,            # (1024, out_pad) bf16 1x1 conv, (1, out_pad) f32
    o_ref,                     # (T, out_pad) bf16
    *, cm, cs4,
):
    eps = 1e-5
    x = x_ref[...].astype(jnp.float32)                       # (T, Cin_pad), f32 for LN stats
    cin_pad = x.shape[-1]

    # Lane mask selecting the s channels [cm, cm+cs4) inside the packed row.
    lane = jax.lax.broadcasted_iota(jnp.int32, (1, cin_pad), 1)
    s_mask = jnp.logical_and(lane >= cm, lane < cm + cs4)    # (1, Cin_pad) bool
    s_mask_f = s_mask.astype(jnp.float32)

    # --- LayerNorm over the up-sampled small-scale lanes (single pass, f32) -
    xs = x * s_mask_f
    sum_s = jnp.sum(xs, axis=-1, keepdims=True)
    sumsq_s = jnp.sum(xs * xs, axis=-1, keepdims=True)
    inv_cs4 = 1.0 / cs4
    mu_s = sum_s * inv_cs4
    var_s = jnp.maximum(sumsq_s * inv_cs4 - mu_s * mu_s, 0.0)
    s_norm = (x - mu_s) * jax.lax.rsqrt(var_s + eps) * g1_ref[...] + bt1_ref[...]
    x_mix = jnp.where(s_mask, s_norm, x)                     # m lanes & pad untouched

    # --- Folded Linear(cin->512) @ Linear(512->1024): single bf16 matmul -----
    h = (
        jnp.dot(x_mix.astype(jnp.bfloat16), w12_ref[...],
                preferred_element_type=jnp.float32)
        + b12_ref[...]
    )

    # --- LayerNorm(1024), single pass over h (largest live tensor) ----------
    inv_n = 1.0 / h.shape[-1]
    sum_h = jnp.sum(h, axis=-1, keepdims=True)
    sumsq_h = jnp.sum(h * h, axis=-1, keepdims=True)
    mu_h = sum_h * inv_n
    var_h = jnp.maximum(sumsq_h * inv_n - mu_h * mu_h, 0.0)
    hn = (h - mu_h) * jax.lax.rsqrt(var_h + eps) * g2_ref[...] + bt2_ref[...]

    # --- 1x1 Conv2d (per-pixel linear, 1024 -> out_pad lanes) ---------------
    out = (
        jnp.dot(hn.astype(jnp.bfloat16), wc_ref[...],
                preferred_element_type=jnp.float32)
        + bc_ref[...]
    )
    o_ref[...] = out.astype(o_ref.dtype)


def _pixel_shuffle_rearrange(s_nchw):
    """einops: 'b h w (neiw neih c) -> b (h neih) (w neiw) c', neih=2, neiw=2.

    Input is NCHW; first permuted to NHWC (matching s.permute(0,2,3,1))."""
    b, cs, hs, ws = s_nchw.shape
    c = cs // 4
    x = jnp.transpose(s_nchw, (0, 2, 3, 1))            # (b, hs, ws, cs)
    x = x.reshape(b, hs, ws, 2, 2, c)                  # (b, hs, ws, neiw, neih, c)
    x = jnp.transpose(x, (0, 1, 4, 2, 3, 5))           # (b, hs, neih, ws, neiw, c)
    return x.reshape(b, hs * 2, ws * 2, c)             # (b, 2hs, 2ws, c)


@functools.partial(jax.jit, static_argnames=("tile_rows",))
def two_scale_mix(m_nchw, s_nchw, params, tile_rows=512):
    B, Cm, H, W = m_nchw.shape
    Cs4 = s_nchw.shape[1] // 4
    out_dim = params["wc"].shape[1]

    cin = Cm + Cs4
    cin_pad = _round_up(cin, 128)
    out_pad = _round_up(out_dim, 128)

    N = B * H * W
    tile = _choose_tile_rows(N, tile_rows)
    n_pad = _cdiv(N, tile) * tile

    # --- layout glue (no compute): NHWC rows, concat [m | s_preLN], pad, bf16
    # TODO(synk): keep the surrounding model NHWC to drop these HBM round-trips.
    m_rows = jnp.transpose(m_nchw, (0, 2, 3, 1)).reshape(N, Cm)
    s_rows = _pixel_shuffle_rearrange(s_nchw).reshape(N, Cs4)
    x_rows = jnp.concatenate([m_rows, s_rows], axis=-1).astype(jnp.bfloat16)
    x_rows = jnp.pad(x_rows, ((0, n_pad - N), (0, cin_pad - cin)))

    # --- weight packing / folding (done once, outside the kernel) -----------
    # LN1 affine placed on the s lanes of the packed row.
    g1p = jnp.zeros((1, cin_pad), jnp.float32).at[:, Cm:cin].set(params["g1"])
    bt1p = jnp.zeros((1, cin_pad), jnp.float32).at[:, Cm:cin].set(params["bt1"])
    # Fold the two back-to-back Linears in f32, then cast bf16 for the MXU.
    w1 = jnp.concatenate([params["w1m"], params["w1s"]], axis=0)       # (cin, 512)
    w1 = jnp.pad(w1, ((0, cin_pad - cin), (0, 0))).astype(jnp.float32)
    w12 = (w1 @ params["w2"].astype(jnp.float32)).astype(jnp.bfloat16)  # (cin_pad, 1024)
    b12 = (params["b1"].astype(jnp.float32) @ params["w2"].astype(jnp.float32)
           + params["b2"].astype(jnp.float32))                          # (1, 1024) f32
    # 1x1 conv: zero-pad output channels to a full 128-lane slab.
    wc = jnp.pad(params["wc"], ((0, 0), (0, out_pad - out_dim))).astype(jnp.bfloat16)
    bc = jnp.pad(params["bc"], ((0, 0), (0, out_pad - out_dim))).astype(jnp.float32)

    grid = (n_pad // tile,)

    def rows_spec(cols):
        return pl.BlockSpec((tile, cols), lambda i: (i, 0))

    def full_spec(shape):
        # Constant across the grid -> Pallas re-uses the block (no re-DMA).
        return pl.BlockSpec(shape, lambda i: (0, 0))

    kernel = functools.partial(_two_scale_mix_kernel, cm=Cm, cs4=Cs4)

    out = pl.pallas_call(
        kernel,
        out_shape=jax.ShapeDtypeStruct((n_pad, out_pad), jnp.bfloat16),
        grid_spec=pltpu.PrefetchScalarGridSpec(
            num_scalar_prefetch=0,
            grid=grid,
            in_specs=[
                rows_spec(cin_pad),                  # packed [m | s] rows (bf16)
                full_spec((1, cin_pad)),             # ln1 gamma (padded)
                full_spec((1, cin_pad)),             # ln1 beta  (padded)
                full_spec((cin_pad, 1024)),          # W12 = W1 @ W2 (bf16)
                full_spec((1, 1024)),                # b12 = b1 @ W2 + b2
                full_spec((1, 1024)),                # ln2 gamma
                full_spec((1, 1024)),                # ln2 beta
                full_spec((1024, out_pad)),          # Wc (bf16, lane-padded)
                full_spec((1, out_pad)),             # bc (lane-padded)
            ],
            out_specs=rows_spec(out_pad),
        ),
        compiler_params=pltpu.CompilerParams(
            dimension_semantics=("parallel",),
        ),
    )(x_rows, g1p, bt1p, w12, b12, params["g2"], params["bt2"], wc, bc)

    out = out[:N, :out_dim].astype(jnp.float32)
    # back to NCHW like the PyTorch module output
    return jnp.transpose(out.reshape(B, H, W, out_dim), (0, 3, 1, 2))


def reference(m_nchw, s_nchw, params):
    """Pure-JAX f32 reference matching the PyTorch forward."""
    eps = 1e-5
    B, Cm, H, W = m_nchw.shape
    s = _pixel_shuffle_rearrange(s_nchw)
    mu = jnp.mean(s, -1, keepdims=True)
    var = jnp.mean((s - mu) ** 2, -1, keepdims=True)
    s = (s - mu) * jax.lax.rsqrt(var + eps) * params["g1"][0] + params["bt1"][0]
    m = jnp.transpose(m_nchw, (0, 2, 3, 1))
    x = jnp.concatenate([m, s], axis=-1)
    w1 = jnp.concatenate([params["w1m"], params["w1s"]], axis=0)
    h1 = x @ w1 + params["b1"][0]
    h2 = h1 @ params["w2"] + params["b2"][0]
    mu = jnp.mean(h2, -1, keepdims=True)
    var = jnp.mean((h2 - mu) ** 2, -1, keepdims=True)
    hn = (h2 - mu) * jax.lax.rsqrt(var + eps) * params["g2"][0] + params["bt2"][0]
    out = hn @ params["wc"] + params["bc"][0]
    return jnp.transpose(out, (0, 3, 1, 2))


def make_params(key, in_dim_m, in_dim_s, out_dim):
    cs4 = in_dim_s // 4
    cin = in_dim_m + cs4
    ks = jax.random.split(key, 8)
    scale = 0.02

    w1 = scale * jax.random.normal(ks[0], (cin, 512), jnp.float32)
    return {
        # LayerNorm(in_dim_s // 4)
        "g1": 1.0 + scale * jax.random.normal(ks[1], (1, cs4), jnp.float32),
        "bt1": scale * jax.random.normal(ks[2], (1, cs4), jnp.float32),
        # Linear(cin -> 512) split into m / s parts
        "w1m": w1[:in_dim_m],
        "w1s": w1[in_dim_m:],
        "b1": scale * jax.random.normal(ks[3], (1, 512), jnp.float32),
        # Linear(512 -> 1024)
        "w2": scale * jax.random.normal(ks[4], (512, 1024), jnp.float32),
        "b2": scale * jax.random.normal(ks[5], (1, 1024), jnp.float32),
        # LayerNorm(1024)
        "g2": jnp.ones((1, 1024), jnp.float32),
        "bt2": jnp.zeros((1, 1024), jnp.float32),
        # Conv2d(1024, out_dim, 1) -> stored transposed as (1024, out_dim)
        "wc": scale * jax.random.normal(ks[6], (1024, out_dim), jnp.float32),
        "bc": scale * jax.random.normal(ks[7], (1, out_dim), jnp.float32),
    }


if __name__ == "__main__":
    # Small shapes: in_dim_m = 32, in_dim_s = 64 (=> up-sampled channels 16),
    # out_dim = 32.  Middle scale: (B, 32, 8, 8); small scale: (B, 64, 4, 4).
    B, Cm, H, W = 2, 32, 8, 8
    Cs = 64
    out_dim = 32

    key = jax.random.PRNGKey(0)
    km, ks_, kp = jax.random.split(key, 3)
    m = jax.random.normal(km, (B, Cm, H, W), jnp.float32)
    s = jax.random.normal(ks_, (B, Cs, H // 2, W // 2), jnp.float32)
    params = make_params(kp, Cm, Cs, out_dim)

    out = two_scale_mix(m, s, params)   # adaptive tile -> 2x 64-row grid steps here
    out = jax.block_until_ready(out)

    ref = jax.block_until_ready(reference(m, s, params))
    assert out.shape == (B, out_dim, H, W), out.shape
    # bf16 activations/weights on the MXU (f32 accumulate) vs f32 reference.
    assert jnp.allclose(out, ref, atol=5e-2, rtol=5e-2), float(
        jnp.max(jnp.abs(out - ref))
    )
    print("KERNEL_OK")
</pallas_src>

<mosaic_0001>
module attributes {stable_mosaic.version = 11 : i64} {
  func.func @_two_scale_mix_kernel(%arg0: i32, %arg1: memref<64x128xbf16, #tpu.memory_space<vmem>>, %arg2: memref<1x128xf32, #tpu.memory_space<vmem>>, %arg3: memref<1x128xf32, #tpu.memory_space<vmem>>, %arg4: memref<128x1024xbf16, #tpu.memory_space<vmem>>, %arg5: memref<1x1024xf32, #tpu.memory_space<vmem>>, %arg6: memref<1x1024xf32, #tpu.memory_space<vmem>>, %arg7: memref<1x1024xf32, #tpu.memory_space<vmem>>, %arg8: memref<1024x128xbf16, #tpu.memory_space<vmem>>, %arg9: memref<1x128xf32, #tpu.memory_space<vmem>>, %arg10: memref<64x128xbf16, #tpu.memory_space<vmem>>) attributes {dimension_semantics = [#tpu.dimension_semantics<parallel>], iteration_bounds = array<i64: 2>, scalar_prefetch = 0 : i64, scratch_operands = 0 : i64, tpu.core_type = #tpu.core_type<tc>, window_params = [{transform_indices = @transform_0, window_bounds = array<i64: 64, 128>}, {pipeline_mode = #tpu.pipeline_mode<synchronous>, transform_indices = @transform_1, window_bounds = array<i64: 1, 128>}, {pipeline_mode = #tpu.pipeline_mode<synchronous>, transform_indices = @transform_2, window_bounds = array<i64: 1, 128>}, {pipeline_mode = #tpu.pipeline_mode<synchronous>, transform_indices = @transform_3, window_bounds = array<i64: 128, 1024>}, {pipeline_mode = #tpu.pipeline_mode<synchronous>, transform_indices = @transform_4, window_bounds = array<i64: 1, 1024>}, {pipeline_mode = #tpu.pipeline_mode<synchronous>, transform_indices = @transform_5, window_bounds = array<i64: 1, 1024>}, {pipeline_mode = #tpu.pipeline_mode<synchronous>, transform_indices = @transform_6, window_bounds = array<i64: 1, 1024>}, {pipeline_mode = #tpu.pipeline_mode<synchronous>, transform_indices = @transform_7, window_bounds = array<i64: 1024, 128>}, {pipeline_mode = #tpu.pipeline_mode<synchronous>, transform_indices = @transform_8, window_bounds = array<i64: 1, 128>}, {transform_indices = @transform_9, window_bounds = array<i64: 64, 128>}]} {
    %c0 = arith.constant 0 : index
    %c0_0 = arith.constant 0 : index
    %0 = vector.load %arg1[%c0, %c0_0] : memref<64x128xbf16, #tpu.memory_space<vmem>>, vector<64x128xbf16>
    %1 = arith.extf %0 : vector<64x128xbf16> to vector<64x128xf32>
    %2 = tpu.iota {dimensions = array<i32: 1>} : vector<1x128xi32>
    %c32_i32 = arith.constant 32 : i32
    %3 = vector.broadcast %c32_i32 : i32 to vector<1x128xi32>
    %4 = arith.cmpi sge, %2, %3 : vector<1x128xi32>
    %c48_i32 = arith.constant 48 : i32
    %5 = vector.broadcast %c48_i32 : i32 to vector<1x128xi32>
    %6 = arith.cmpi slt, %2, %5 : vector<1x128xi32>
    %7 = arith.andi %4, %6 : vector<1x128xi1>
    %8 = arith.extui %7 : vector<1x128xi1> to vector<1x128xi32>
    %9 = arith.sitofp %8 : vector<1x128xi32> to vector<1x128xf32>
    %10 = vector.broadcast %9 : vector<1x128xf32> to vector<64x128xf32>
    %11 = arith.mulf %1, %10 : vector<64x128xf32>
    %cst = arith.constant dense<0.000000e+00> : vector<64xf32>
    %12 = vector.multi_reduction <add>, %11, %cst [1] : vector<64x128xf32> to vector<64xf32>
    %13 = vector.shape_cast %12 : vector<64xf32> to vector<64x1xf32>
    %14 = arith.mulf %11, %11 : vector<64x128xf32>
    %cst_1 = arith.constant dense<0.000000e+00> : vector<64xf32>
    %15 = vector.multi_reduction <add>, %14, %cst_1 [1] : vector<64x128xf32> to vector<64xf32>
    %16 = vector.shape_cast %15 : vector<64xf32> to vector<64x1xf32>
    %cst_2 = arith.constant 6.250000e-02 : f32
    %17 = vector.broadcast %cst_2 : f32 to vector<64x1xf32>
    %18 = arith.mulf %13, %17 : vector<64x1xf32>
    %cst_3 = arith.constant 6.250000e-02 : f32
    %19 = vector.broadcast %cst_3 : f32 to vector<64x1xf32>
    %20 = arith.mulf %16, %19 : vector<64x1xf32>
    %21 = arith.mulf %18, %18 : vector<64x1xf32>
    %22 = arith.subf %20, %21 : vector<64x1xf32>
    %cst_4 = arith.constant 0.000000e+00 : f32
    %23 = vector.broadcast %cst_4 : f32 to vector<64x1xf32>
    %24 = arith.maximumf %22, %23 : vector<64x1xf32>
    %25 = vector.broadcast %18 : vector<64x1xf32> to vector<64x128xf32>
    %26 = arith.subf %1, %25 : vector<64x128xf32>
    %cst_5 = arith.constant 9.99999974E-6 : f32
    %27 = vector.broadcast %cst_5 : f32 to vector<64x1xf32>
    %28 = arith.addf %24, %27 : vector<64x1xf32>
    %29 = math.rsqrt %28 : vector<64x1xf32>
    %30 = vector.broadcast %29 : vector<64x1xf32> to vector<64x128xf32>
    %31 = arith.mulf %26, %30 : vector<64x128xf32>
    %c0_6 = arith.constant 0 : index
    %c0_7 = arith.constant 0 : index
    %32 = vector.load %arg2[%c0_6, %c0_7] : memref<1x128xf32, #tpu.memory_space<vmem>>, vector<1x128xf32>
    %33 = vector.broadcast %32 : vector<1x128xf32> to vector<64x128xf32>
    %34 = arith.mulf %31, %33 : vector<64x128xf32>
    %c0_8 = arith.constant 0 : index
    %c0_9 = arith.constant 0 : index
    %35 = vector.load %arg3[%c0_8, %c0_9] : memref<1x128xf32, #tpu.memory_space<vmem>>, vector<1x128xf32>
    %36 = vector.broadcast %35 : vector<1x128xf32> to vector<64x128xf32>
    %37 = arith.addf %34, %36 : vector<64x128xf32>
    %38 = vector.shape_cast %7 : vector<1x128xi1> to vector<1x128xi1>
    %39 = vector.broadcast %38 : vector<1x128xi1> to vector<64x128xi1>
    %40 = arith.select %39, %37, %1 : vector<64x128xi1>, vector<64x128xf32>
    %41 = arith.truncf %40 : vector<64x128xf32> to vector<64x128xbf16>
    %c0_10 = arith.constant 0 : index
    %c0_11 = arith.constant 0 : index
    %42 = vector.load %arg4[%c0_10, %c0_11] : memref<128x1024xbf16, #tpu.memory_space<vmem>>, vector<128x1024xbf16>
    %cst_12 = arith.constant dense<0.000000e+00> : vector<64x1024xf32>
    %43 = tpu.matmul %41, %42, %cst_12 {dimension_numbers = #tpu.dot_dimension_numbers<[1], [0], [0], [1], [0, 0, 1, 1], [], []>} : vector<64x128xbf16>, vector<128x1024xbf16>, vector<64x1024xf32> -> vector<64x1024xf32>
    %c0_13 = arith.constant 0 : index
    %c0_14 = arith.constant 0 : index
    %44 = vector.load %arg5[%c0_13, %c0_14] : memref<1x1024xf32, #tpu.memory_space<vmem>>, vector<1x1024xf32>
    %45 = vector.broadcast %44 : vector<1x1024xf32> to vector<64x1024xf32>
    %46 = arith.addf %43, %45 : vector<64x1024xf32>
    %cst_15 = arith.constant dense<0.000000e+00> : vector<64xf32>
    %47 = vector.multi_reduction <add>, %46, %cst_15 [1] : vector<64x1024xf32> to vector<64xf32>
    %48 = vector.shape_cast %47 : vector<64xf32> to vector<64x1xf32>
    %49 = arith.mulf %46, %46 : vector<64x1024xf32>
    %cst_16 = arith.constant dense<0.000000e+00> : vector<64xf32>
    %50 = vector.multi_reduction <add>, %49, %cst_16 [1] : vector<64x1024xf32> to vector<64xf32>
    %51 = vector.shape_cast %50 : vector<64xf32> to vector<64x1xf32>
    %cst_17 = arith.constant 9.765625E-4 : f32
    %52 = vector.broadcast %cst_17 : f32 to vector<64x1xf32>
    %53 = arith.mulf %48, %52 : vector<64x1xf32>
    %cst_18 = arith.constant 9.765625E-4 : f32
    %54 = vector.broadcast %cst_18 : f32 to vector<64x1xf32>
    %55 = arith.mulf %51, %54 : vector<64x1xf32>
    %56 = arith.mulf %53, %53 : vector<64x1xf32>
    %57 = arith.subf %55, %56 : vector<64x1xf32>
    %cst_19 = arith.constant 0.000000e+00 : f32
    %58 = vector.broadcast %cst_19 : f32 to vector<64x1xf32>
    %59 = arith.maximumf %57, %58 : vector<64x1xf32>
    %60 = vector.broadcast %53 : vector<64x1xf32> to vector<64x1024xf32>
    %61 = arith.subf %46, %60 : vector<64x1024xf32>
    %cst_20 = arith.constant 9.99999974E-6 : f32
    %62 = vector.broadcast %cst_20 : f32 to vector<64x1xf32>
    %63 = arith.addf %59, %62 : vector<64x1xf32>
    %64 = math.rsqrt %63 : vector<64x1xf32>
    %65 = vector.broadcast %64 : vector<64x1xf32> to vector<64x1024xf32>
    %66 = arith.mulf %61, %65 : vector<64x1024xf32>
    %c0_21 = arith.constant 0 : index
    %c0_22 = arith.constant 0 : index
    %67 = vector.load %arg6[%c0_21, %c0_22] : memref<1x1024xf32, #tpu.memory_space<vmem>>, vector<1x1024xf32>
    %68 = vector.broadcast %67 : vector<1x1024xf32> to vector<64x1024xf32>
    %69 = arith.mulf %66, %68 : vector<64x1024xf32>
    %c0_23 = arith.constant 0 : index
    %c0_24 = arith.constant 0 : index
    %70 = vector.load %arg7[%c0_23, %c0_24] : memref<1x1024xf32, #tpu.memory_space<vmem>>, vector<1x1024xf32>
    %71 = vector.broadcast %70 : vector<1x1024xf32> to vector<64x1024xf32>
    %72 = arith.addf %69, %71 : vector<64x1024xf32>
    %73 = arith.truncf %72 : vector<64x1024xf32> to vector<64x1024xbf16>
    %c0_25 = arith.constant 0 : index
    %c0_26 = arith.constant 0 : index
    %74 = vector.load %arg8[%c0_25, %c0_26] : memref<1024x128xbf16, #tpu.memory_space<vmem>>, vector<1024x128xbf16>
    %cst_27 = arith.constant dense<0.000000e+00> : vector<64x128xf32>
    %75 = tpu.matmul %73, %74, %cst_27 {dimension_numbers = #tpu.dot_dimension_numbers<[1], [0], [0], [1], [0, 0, 1, 1], [], []>} : vector<64x1024xbf16>, vector<1024x128xbf16>, vector<64x128xf32> -> vector<64x128xf32>
    %c0_28 = arith.constant 0 : index
    %c0_29 = arith.constant 0 : index
    %76 = vector.load %arg9[%c0_28, %c0_29] : memref<1x128xf32, #tpu.memory_space<vmem>>, vector<1x128xf32>
    %77 = vector.broadcast %76 : vector<1x128xf32> to vector<64x128xf32>
    %78 = arith.addf %75, %77 : vector<64x128xf32>
    %79 = arith.truncf %78 : vector<64x128xf32> to vector<64x128xbf16>
    %c0_30 = arith.constant 0 : index
    %c0_31 = arith.constant 0 : index
    %80 = vector.load %arg10[%c0_30, %c0_31] : memref<64x128xbf16, #tpu.memory_space<vmem>>, vector<64x128xbf16>
    tpu.vector_store %arg10[%c0_30, %c0_31], %79 {strides = array<i32>} : memref<64x128xbf16, #tpu.memory_space<vmem>>, vector<64x128xbf16>,
    return
  }
  func.func @transform_0(%arg0: i32) -> (i32, i32) {
    %c0_i32 = arith.constant 0 : i32
    %c0_i32_0 = arith.constant 0 : i32
    return %arg0, %c0_i32 : i32, i32
  }
  func.func @transform_1(%arg0: i32) -> (i32, i32) {
    %c0_i32 = arith.constant 0 : i32
    %c0_i32_0 = arith.constant 0 : i32
    %c0_i32_1 = arith.constant 0 : i32
    return %c0_i32, %c0_i32_0 : i32, i32
  }
  func.func @transform_2(%arg0: i32) -> (i32, i32) {
    %c0_i32 = arith.constant 0 : i32
    %c0_i32_0 = arith.constant 0 : i32
    %c0_i32_1 = arith.constant 0 : i32
    return %c0_i32, %c0_i32_0 : i32, i32
  }
  func.func @transform_3(%arg0: i32) -> (i32, i32) {
    %c0_i32 = arith.constant 0 : i32
    %c0_i32_0 = arith.constant 0 : i32
    %c0_i32_1 = arith.constant 0 : i32
    return %c0_i32, %c0_i32_0 : i32, i32
  }
  func.func @transform_4(%arg0: i32) -> (i32, i32) {
    %c0_i32 = arith.constant 0 : i32
    %c0_i32_0 = arith.constant 0 : i32
    %c0_i32_1 = arith.constant 0 : i32
    return %c0_i32, %c0_i32_0 : i32, i32
  }
  func.func @transform_5(%arg0: i32) -> (i32, i32) {
    %c0_i32 = arith.constant 0 : i32
    %c0_i32_0 = arith.constant 0 : i32
    %c0_i32_1 = arith.constant 0 : i32
    return %c0_i32, %c0_i32_0 : i32, i32
  }
  func.func @transform_6(%arg0: i32) -> (i32, i32) {
    %c0_i32 = arith.constant 0 : i32
    %c0_i32_0 = arith.constant 0 : i32
    %c0_i32_1 = arith.constant 0 : i32
    return %c0_i32, %c0_i32_0 : i32, i32
  }
  func.func @transform_7(%arg0: i32) -> (i32, i32) {
    %c0_i32 = arith.constant 0 : i32
    %c0_i32_0 = arith.constant 0 : i32
    %c0_i32_1 = arith.constant 0 : i32
    return %c0_i32, %c0_i32_0 : i32, i32
  }
  func.func @transform_8(%arg0: i32) -> (i32, i32) {
    %c0_i32 = arith.constant 0 : i32
    %c0_i32_0 = arith.constant 0 : i32
    %c0_i32_1 = arith.constant 0 : i32
    return %c0_i32, %c0_i32_0 : i32, i32
  }
  func.func @transform_9(%arg0: i32) -> (i32, i32) {
    %c0_i32 = arith.constant 0 : i32
    %c0_i32_0 = arith.constant 0 : i32
    return %arg0, %c0_i32 : i32, i32
  }
}

</mosaic_0001>

<bundles_post_ra>
// kernel: two_scale_mix.1
= control target key start
LH: loop header
LB: loop body
LE: loop exit
PB: predicated region body
PF: predicated region fallthrough
CT: control target
= control target key end

     0   :  { %s3279_s30 = smov 0   ;;  %s4969_s0 = inlined_call_operand.vmem [shape: bf16[128,128], index: 0, kind: input, shape index: {}]   ;;  %s4970_s1 = inlined_call_operand.vmem [shape: f32[1,128], index: 1, kind: input, shape index: {}]   ;;  %s4971_s2 = inlined_call_operand.vmem [shape: f32[1,128], index: 2, kind: input, shape index: {}]   ;;  %s4972_s3 = inlined_call_operand.vmem [shape: bf16[128,1024], index: 3, kind: input, shape index: {}]   ;;  %s4973_s4 = inlined_call_operand.vmem [shape: f32[1,1024], index: 4, kind: input, shape index: {}]   ;;  %s4974_s5 = inlined_call_operand.vmem [shape: f32[1,1024], index: 5, kind: input, shape index: {}]   ;;  %s4975_s6 = inlined_call_operand.vmem [shape: f32[1,1024], index: 6, kind: input, shape index: {}]   ;;  %s4976_s7 = inlined_call_operand.vmem [shape: bf16[1024,128], index: 7, kind: input, shape index: {}]   ;;  %s4977_s8 = inlined_call_operand.vmem [shape: f32[1,128], index: 8, kind: input, shape index: {}]   ;;  %s4978_s9 = inlined_call_operand.vmem [shape: bf16[128,128], index: 9, kind: output, shape index: {}]  }
   0x1 LB: > { %s2752_s10 = sadd.s32 4294967295, %s3225_s30   ;;  %p2756_p0 = scmp.ge.s32.totalorder %s3225_s30, 1  ;;  %s3225_s30 = sphi %s3279_s30, %s19_s30  }
   0x2   : > { %p288_p1 = scmp.lt.s32.totalorder %s3225_s30, 3 }
   0x4   : > { %p289_p2 = pnand %p2756_p0, %p288_p1 }
   0x6   : > { %292 = sbr.rel (%p289_p2) target bundleno = 888 (0x378), region = 56 }
   0xb   : > { %s2757_s11 = sshll.u32 %s2752_s10, 3  ;;  %v353_v0 = vlaneseq  ;;  %v3227_v4 = vmov 0.0   ;;  %v579_v24 = vld [vmem:[%s4972_s3 + $0x1c0] sm:$0xff]  ;;  %v580_v26 = vld [vmem:[%s4972_s3 + $0x1c8] sm:$0xff] }
   0xc   : > { %p325_p3 = scmp.lt.s32.totalorder %s2757_s11, 15  ;;  %v583_v25 = vld [vmem:[%s4972_s3 + $0x1e0] sm:$0xff]  ;;  %v584_v28 = vld [vmem:[%s4972_s3 + $0x1e8] sm:$0xff] }
   0xd   : > { %v354_v1 = vand.u32 127, %v353_v0  ;;  %v2821_v27 = vcombine.high %v579_v24, %v583_v25  ;;  %v2820_v30 = vcombine.low %v579_v24, %v583_v25  ;;  %v2823_v31 = vcombine.high %v580_v26, %v584_v28  ;;  %v571_v35 = vld [vmem:[%s4972_s3 + $0x180] sm:$0xff]  ;;  %v572_v37 = vld [vmem:[%s4972_s3 + $0x188] sm:$0xff] }
   0xe   : > { %s5234_s11 = smov (!%p325_p3, %s2757_s11), 15  ;;  %v2822_v32 = vcombine.low %v580_v26, %v584_v28  ;;  %v575_v36 = vld [vmem:[%s4972_s3 + $0x1a0] sm:$0xff]  ;;  %v576_v39 = vld [vmem:[%s4972_s3 + $0x1a8] sm:$0xff]  ;;  %v590_v2 = vshrl.u32 %v353_v0, 7 }
   0xf   : > { %vm355_vm0 = vcmp.ge.s32.totalorder %v354_v1, 32  ;;  %vm356_vm1 = vcmp.lt.s32.totalorder %v354_v1, 48  ;;  %s2758_s12 = sshll.u32 %s5234_s11, 2  ;;  %949 = vmatprep.subr.bf16.mxu0 %v2821_v27  ;;  %1022 = vmatprep.subr.bf16.mxu1 %v2823_v31  ;;  %v2813_v38 = vcombine.high %v571_v35, %v575_v36  ;;  %v2812_v42 = vcombine.low %v571_v35, %v575_v36  ;;  %v563_v46 = vld [vmem:[%s4972_s3 + $0x140] sm:$0xff]  ;;  %v564_v48 = vld [vmem:[%s4972_s3 + $0x148] sm:$0xff] }
  0x10   : > { %vm3291_vm2 = vmand %vm355_vm0, %vm356_vm1  ;;  %s328_s15 = scalar_lea.vmem %s4969_s0, %s2758_s12  ;;  %950 = vmatpush1.bf16.msra.mxu0 %v2820_v30  ;;  %1023 = vmatpush1.bf16.msra.mxu1 %v2822_v32  ;;  %v2815_v43 = vcombine.high %v572_v37, %v576_v39  ;;  %v2814_v44 = vcombine.low %v572_v37, %v576_v39  ;;  %v567_v47 = vld [vmem:[%s4972_s3 + $0x160] sm:$0xff]  ;;  %v568_v51 = vld [vmem:[%s4972_s3 + $0x168] sm:$0xff]  ;;  %s4944_s16 = scalar_lea.vmem %s4978_s9, %s2758_s12 }
  0x11   : > { %v2912_v3 = vld [vmem:[%s328_s15] sm:$0xff]   ;;  %v3302_v5 = vsel %vm3291_vm2, 1.0, %v3227_v4  ;;  %v2947_v8 = vld [vmem:[%s328_s15 + $0x8] sm:$0xff]   ;;  %v2948_v15 = vld [vmem:[%s328_s15 + $0x10] sm:$0xff]   ;;  %951 = vmatprep.subr.bf16.mxu0 %v2813_v38  ;;  %v2805_v50 = vcombine.high %v563_v46, %v567_v47  ;;  %v2804_v52 = vcombine.low %v563_v46, %v567_v47  ;;  %v2807_v53 = vcombine.high %v564_v48, %v568_v51 }
  0x12   : > { %v3304_v6 = vunpack.c.l.bf16 %v2912_v3  ;;  %v3306_v7 = vunpack.c.h.bf16 %v2912_v3  ;;  %v3312_v12 = vunpack.c.l.bf16 %v2947_v8  ;;  %v3314_v14 = vunpack.c.h.bf16 %v2947_v8  ;;  %v2949_v22 = vld [vmem:[%s328_s15 + $0x18] sm:$0xff]   ;;  %1024 = vmatprep.subr.bf16.mxu1 %v2815_v43  ;;  %v555_v56 = vld [vmem:[%s4972_s3 + $0x100] sm:$0xff]  ;;  %v556_v58 = vld [vmem:[%s4972_s3 + $0x108] sm:$0xff] }
  0x13   : > { %v3320_v19 = vunpack.c.l.bf16 %v2948_v15  ;;  %v3322_v21 = vunpack.c.h.bf16 %v2948_v15  ;;  %v3340_v34 = vunpack.c.l.bf16 %v2949_v22  ;;  %v3354_v41 = vunpack.c.h.bf16 %v2949_v22  ;;  %v559_v57 = vld [vmem:[%s4972_s3 + $0x120] sm:$0xff]  ;;  %v560_v61 = vld [vmem:[%s4972_s3 + $0x128] sm:$0xff]  ;;  %v3435_v43 = vld [vmem:[%s4972_s3 + $0x1d0] sm:$0xff] }
  0x14   : > { %v360_v9 = vmul.f32 %v3304_v6, %v3302_v5  ;;  %v361_v10 = vmul.f32 %v3306_v7, %v3302_v5  ;;  %v362_v16 = vmul.f32 %v3312_v12, %v3302_v5  ;;  %v363_v17 = vmul.f32 %v3314_v14, %v3302_v5  ;;  %952 = vmatpush1.bf16.msra.mxu0 %v2812_v42  ;;  %v547_v3 = vld [vmem:[%s4972_s3 + $0xc0] sm:$0xff]  ;;  %v532_v27 = vld [vmem:[%s4972_s3 + $0x48] sm:$0xff]  ;;  %v3452_v47 = vld [vmem:[%s4972_s3 + $0x1f8] sm:$0xff] }
  0x15   : > { %v364_v23 = vmul.f32 %v3320_v19, %v3302_v5  ;;  %v365_v29 = vmul.f32 %v3322_v21, %v3302_v5  ;;  %v366_v45 = vmul.f32 %v3340_v34, %v3302_v5  ;;  %v367_v49 = vmul.f32 %v3354_v41, %v3302_v5  ;;  %1025 = vmatpush1.bf16.msra.mxu1 %v2814_v44  ;;  %v551_v4 = vld [vmem:[%s4972_s3 + $0xe0] sm:$0xff]  ;;  %v548_v5 = vld [vmem:[%s4972_s3 + $0xc8] sm:$0xff]  ;;  %v3440_v44 = vld [vmem:[%s4972_s3 + $0x1f0] sm:$0xff] }
  0x16   : > { %368 = vadd.xlane.f32.xlu0 %v360_v9  ;;  %v384_v11 = vmul.f32 %v360_v9, %v360_v9  ;;  %v385_v13 = vmul.f32 %v361_v10, %v361_v10  ;;  %v386_v18 = vmul.f32 %v362_v16, %v362_v16  ;;  %v387_v20 = vmul.f32 %v363_v17, %v363_v17  ;;  %v552_v9 = vld [vmem:[%s4972_s3 + $0xe8] sm:$0xff]  ;;  %v539_v15 = vld [vmem:[%s4972_s3 + $0x80] sm:$0xff] }
  0x17   : > { %v388_v33 = vmul.f32 %v364_v23, %v364_v23  ;;  %v389_v40 = vmul.f32 %v365_v29, %v365_v29  ;;  %v2806_v54 = vcombine.low %v564_v48, %v568_v51  ;;  %v390_v55 = vmul.f32 %v366_v45, %v366_v45  ;;  %953 = vmatprep.subr.bf16.mxu0 %v2805_v50  ;;  %v531_v25 = vld [vmem:[%s4972_s3 + $0x40] sm:$0xff]  ;;  %v524_v36 = vld [vmem:[%s4972_s3 + $0x8] sm:$0xff] }
  0x18   : > { %392 = vadd.xlane.f32.xlu1 %v384_v11  ;;  %954 = vmatpush1.bf16.msra.mxu0 %v2804_v52  ;;  %v391_v59 = vmul.f32 %v367_v49, %v367_v49  ;;  %v2797_v60 = vcombine.high %v555_v56, %v559_v57  ;;  %v2796_v62 = vcombine.low %v555_v56, %v559_v57  ;;  %v535_v26 = vld [vmem:[%s4972_s3 + $0x60] sm:$0xff]  ;;  %v528_v38 = vld [vmem:[%s4972_s3 + $0x28] sm:$0xff]  ;;  %v3228_v48 = vmov 0  }
  0x19   : > { %1026 = vmatprep.subr.bf16.mxu1 %v2807_v53  ;;  %v2799_v63 = vcombine.high %v556_v58, %v560_v61  ;;  %v2798_v1 = vcombine.low %v556_v58, %v560_v61  ;;  %v2789_v8 = vcombine.high %v547_v3, %v551_v4  ;;  %v2791_v11 = vcombine.high %v548_v5, %v552_v9  ;;  %v527_v35 = vld [vmem:[%s4972_s3 + $0x20] sm:$0xff] }
  0x1a   : > { %370 = vadd.xlane.f32.xlu0 %v361_v10  ;;  %1027 = vmatpush1.bf16.msra.mxu1 %v2806_v54  ;;  %v2788_v10 = vcombine.low %v547_v3, %v551_v4  ;;  %v2773_v28 = vcombine.high %v531_v25, %v535_v26  ;;  %v2772_v30 = vcombine.low %v531_v25, %v535_v26 }
  0x1b   : > { %955 = vmatprep.subr.bf16.mxu0 %v2797_v60  ;;  %1028 = vmatprep.subr.bf16.mxu1 %v2799_v63  ;;  %v2766_v42 = vcombine.low %v524_v36, %v528_v38  ;;  %v2825_v46 = vcombine.high %v3435_v43, %v3440_v44 }
  0x1c   : > { %394 = vadd.xlane.f32.xlu1 %v385_v13  ;;  %956 = vmatpush1.bf16.msra.mxu0 %v2796_v62  ;;  %v2790_v13 = vcombine.low %v548_v5, %v552_v9 }
  0x1d   : > { %957 = vmatprep.subr.bf16.mxu0 %v2789_v8  ;;  %981 = vmatprep.mubr.bf16.mxu0 %v3228_v48 }
  0x1e   : > { %372 = vadd.xlane.f32.xlu0 %v362_v16  ;;  %1029 = vmatpush1.bf16.msra.mxu1 %v2798_v1  ;;  %v543_v16 = vld [vmem:[%s4972_s3 + $0xa0] sm:$0xff] }
  0x1f   : > { %1030 = vmatprep.subr.bf16.mxu1 %v2791_v11  ;;  %v2780_v22 = vcombine.low %v539_v15, %v543_v16  ;;  %1054 = vmatprep.mubr.bf16.mxu1 %v3228_v48 }
  0x20   : > { %374 = vadd.xlane.f32.xlu1 %v363_v17  ;;  %958 = vmatpush1.bf16.msra.mxu0 %v2788_v10  ;;  %v540_v17 = vld [vmem:[%s4972_s3 + $0x88] sm:$0xff] }
  0x22   : > { %396 = vadd.xlane.f32.xlu0 %v386_v18  ;;  %1031 = vmatpush1.bf16.msra.mxu1 %v2790_v13  ;;  %v2781_v18 = vcombine.high %v539_v15, %v543_v16 }
  0x24   : > { %398 = vadd.xlane.f32.xlu1 %v387_v20  ;;  %v544_v20 = vld [vmem:[%s4972_s3 + $0xa8] sm:$0xff]  ;;  %959 = vmatprep.subr.bf16.mxu0 %v2781_v18 }
  0x25   : > { %v2782_v24 = vcombine.low %v540_v17, %v544_v20  ;;  %960 = vmatpush1.bf16.msra.mxu0 %v2780_v22 }
  0x26   : > { %376 = vadd.xlane.f32.xlu0 %v364_v23  ;;  %v2783_v23 = vcombine.high %v540_v17, %v544_v20  ;;  %961 = vmatprep.subr.bf16.mxu0 %v2773_v28 }
  0x28   : > { %378 = vadd.xlane.f32.xlu1 %v365_v29  ;;  %1032 = vmatprep.subr.bf16.mxu1 %v2783_v23  ;;  %v536_v29 = vld [vmem:[%s4972_s3 + $0x68] sm:$0xff] }
  0x29   : > { %1033 = vmatpush1.bf16.msra.mxu1 %v2782_v24  ;;  %v2775_v31 = vcombine.high %v532_v27, %v536_v29  ;;  %v2774_v32 = vcombine.low %v532_v27, %v536_v29  ;;  %962 = vmatpush1.bf16.msra.mxu0 %v2772_v30 }
  0x2a   : > { %400 = vadd.xlane.f32.xlu0 %v388_v33  ;;  %v523_v33 = vld [vmem:[%s4972_s3] sm:$0xff] }
  0x2b   : > { %1034 = vmatprep.subr.bf16.mxu1 %v2775_v31  ;;  %v2765_v37 = vcombine.high %v523_v33, %v527_v35  ;;  %v2764_v39 = vcombine.low %v523_v33, %v527_v35 }
  0x2c   : > { %402 = vadd.xlane.f32.xlu1 %v389_v40  ;;  %v2767_v40 = vcombine.high %v524_v36, %v528_v38 }
  0x2d   : > { %1035 = vmatpush1.bf16.msra.mxu1 %v2774_v32  ;;  %963 = vmatprep.subr.bf16.mxu0 %v2765_v37 }
  0x2e   : > { %380 = vadd.xlane.f32.xlu0 %v366_v45  ;;  %964 = vmatpush1.bf16.msra.mxu0 %v2764_v39  ;;  %v3445_v45 = vld [vmem:[%s4972_s3 + $0x1d8] sm:$0xff] }
  0x2f   : > { %1036 = vmatprep.subr.bf16.mxu1 %v2767_v40  ;;  %v2826_v50 = vcombine.low %v3445_v45, %v3452_v47  ;;  %v2827_v51 = vcombine.high %v3445_v45, %v3452_v47  ;;  %1095 = vmatprep.subr.bf16.mxu0 %v2825_v46  ;;  %v561_v45 = vld [vmem:[%s4972_s3 + $0x130] sm:$0xff]  ;;  %v558_v47 = vld [vmem:[%s4972_s3 + $0x118] sm:$0xff] }
  0x30   : > { %382 = vadd.xlane.f32.xlu1 %v367_v49  ;;  %v2824_v49 = vcombine.low %v3435_v43, %v3440_v44 }
  0x31   : > { %1037 = vmatpush1.bf16.msra.mxu1 %v2766_v42 }
  0x32   : > { %404 = vadd.xlane.f32.xlu0 %v390_v55  ;;  %1168 = vmatprep.subr.bf16.mxu1 %v2827_v51 }
  0x34   : > { %406 = vadd.xlane.f32.xlu1 %v391_v59 }
  0x9f   : > { %v369_v52 = vpop.xlane.xlu0 %368 }
  0xa0   : > { %v408_v53 = vmul.f32 0.0625, %v369_v52 }
  0xa1   : > { %v393_v54 = vpop.xlane.xlu1 %392 }
  0xa2   : > { %v424_v55 = vmul.f32 %v408_v53, %v408_v53  ;;  %v416_v56 = vmul.f32 0.0625, %v393_v54  ;;  %v448_v36 = vsub.f32 %v3304_v6, %v408_v53 }
  0xa3   : > { %v371_v57 = vpop.xlane.xlu0 %370 }
  0xa4   : > { %v432_v58 = vsub.f32 %v416_v56, %v424_v55  ;;  %v409_v59 = vmul.f32 0.0625, %v371_v57  ;;  %v3484_v56 = vld [vmem:[%s4970_s1] ss:$0 sm:$0xff] }
  0xa5   : > { %v395_v60 = vpop.xlane.xlu1 %394 }
  0xa6   : > { %v440_v61 = vmax.f32 %v432_v58, 0.0  ;;  %v425_v62 = vmul.f32 %v409_v59, %v409_v59  ;;  %v417_v63 = vmul.f32 0.0625, %v395_v60  ;;  %v449_v57 = vsub.f32 %v3306_v7, %v409_v59 }
  0xa7   : > { %v373_v1 = vpop.xlane.xlu0 %372 }
  0xa8   : > { %v456_v3 = vadd.f32 1e-05, %v440_v61  ;;  %v433_v4 = vsub.f32 %v417_v63, %v425_v62  ;;  %v3462_v5 = vmul.f32 0.0625, %v373_v1  ;;  %v3492_v62 = vld [vmem:[%s4971_s2] ss:$0 sm:$0xff] }
  0xa9   : > { %v375_v8 = vpop.xlane.xlu1 %374 }
  0xaa   : > { %3187 = vrsqrt.f32 %v456_v3  ;;  %v441_v9 = vmax.f32 %v433_v4, 0.0  ;;  %v426_v10 = vmul.f32 %v3462_v5, %v3462_v5  ;;  %v3466_v11 = vmul.f32 0.0625, %v375_v8 }
  0xab   : > { %v397_v13 = vpop.xlane.xlu0 %396 }
  0xac   : > { %v457_v15 = vadd.f32 1e-05, %v441_v9  ;;  %v418_v16 = vmul.f32 0.0625, %v397_v13  ;;  %v427_v18 = vmul.f32 %v3466_v11, %v3466_v11 }
  0xad   : > { %v399_v17 = vpop.xlane.xlu1 %398 }
  0xae   : > { %3189 = vrsqrt.f32 %v457_v15  ;;  %v434_v20 = vsub.f32 %v418_v16, %v426_v10  ;;  %v419_v22 = vmul.f32 0.0625, %v399_v17 }
  0xaf   : > { %v377_v23 = vpop.xlane.xlu0 %376 }
  0xb0   : > { %v442_v24 = vmax.f32 %v434_v20, 0.0  ;;  %v435_v25 = vsub.f32 %v419_v22, %v427_v18  ;;  %v3470_v26 = vmul.f32 0.0625, %v377_v23  ;;  %v573_v20 = vld [vmem:[%s4972_s3 + $0x190] sm:$0xff]  ;;  %v450_v22 = vsub.f32 %v3312_v12, %v3462_v5 }
  0xb1   : > { %v379_v27 = vpop.xlane.xlu1 %378  ;;  %v451_v5 = vsub.f32 %v3314_v14, %v3466_v11  ;;  %v565_v11 = vld [vmem:[%s4972_s3 + $0x150] sm:$0xff] }
  0xb2   : > { %v458_v28 = vadd.f32 1e-05, %v442_v24  ;;  %v443_v29 = vmax.f32 %v435_v25, 0.0  ;;  %v428_v30 = vmul.f32 %v3470_v26, %v3470_v26  ;;  %v3474_v31 = vmul.f32 0.0625, %v379_v27  ;;  %v577_v27 = vld [vmem:[%s4972_s3 + $0x1b0] sm:$0xff] }
  0xb3   : > { %v401_v32 = vpop.xlane.xlu0 %400  ;;  %v452_v43 = vsub.f32 %v3320_v19, %v3470_v26 }
  0xb4   : > { %3191 = vrsqrt.f32 %v458_v28  ;;  %v459_v33 = vadd.f32 1e-05, %v443_v29  ;;  %v420_v35 = vmul.f32 0.0625, %v401_v32  ;;  %v429_v38 = vmul.f32 %v3474_v31, %v3474_v31  ;;  %v574_v28 = vld [vmem:[%s4972_s3 + $0x198] sm:$0xff] }
  0xb5   : > { %v403_v37 = vpop.xlane.xlu1 %402  ;;  %v578_v29 = vld [vmem:[%s4972_s3 + $0x1b8] sm:$0xff]  ;;  %v453_v26 = vsub.f32 %v3322_v21, %v3474_v31 }
  0xb6   : > { %3193 = vrsqrt.f32 %v459_v33  ;;  %v436_v39 = vsub.f32 %v420_v35, %v428_v30  ;;  %v421_v40 = vmul.f32 0.0625, %v403_v37 }
  0xb7   : > { %v3188_v42 = vpop.eup %3187  ;;  %v381_v46 = vpop.xlane.xlu0 %380 }
  0xb8   : > { %v444_v51 = vmax.f32 %v436_v39, 0.0  ;;  %v437_v52 = vsub.f32 %v421_v40, %v429_v38  ;;  %v3479_v54 = vmul.f32 0.0625, %v381_v46  ;;  %v472_v55 = vmul.f32 %v3188_v42, %v448_v36 }
  0xb9   : > { %v383_v53 = vpop.xlane.xlu1 %382  ;;  %v2817_v40 = vcombine.high %v573_v20, %v577_v27  ;;  %v2819_v42 = vcombine.high %v574_v28, %v578_v29 }
  0xba   : > { %v460_v58 = vadd.f32 1e-05, %v444_v51  ;;  %v445_v60 = vmax.f32 %v437_v52, 0.0  ;;  %v430_v61 = vmul.f32 %v3479_v54, %v3479_v54  ;;  %v3494_v1 = vmul.f32 0.0625, %v383_v53 }
  0xbb   : > { %v3190_v63 = vpop.eup %3189  ;;  %v405_v3 = vpop.xlane.xlu0 %404  ;;  %v487_v4 = vmul.f32 %v3484_v56, %v472_v55  ;;  %v570_v55 = vld [vmem:[%s4972_s3 + $0x178] sm:$0xff]  ;;  %v2816_v53 = vcombine.low %v573_v20, %v577_v27 }
  0xbc   : > { %3195 = vrsqrt.f32 %v460_v58  ;;  %v461_v8 = vadd.f32 1e-05, %v445_v60  ;;  %v422_v9 = vmul.f32 0.0625, %v405_v3  ;;  %v473_v59 = vmul.f32 %v3190_v63, %v449_v57  ;;  %v557_v3 = vld [vmem:[%s4972_s3 + $0x110] sm:$0xff] }
  0xbd   : > { %v431_v10 = vmul.f32 %v3494_v1, %v3494_v1  ;;  %v407_v13 = vpop.xlane.xlu1 %406  ;;  %v502_v15 = vadd.f32 %v3492_v62, %v487_v4  ;;  %v2818_v57 = vcombine.low %v574_v28, %v578_v29 }
  0xbe   : > { %3197 = vrsqrt.f32 %v461_v8  ;;  %v438_v16 = vsub.f32 %v422_v9, %v430_v61  ;;  %v423_v17 = vmul.f32 0.0625, %v407_v13  ;;  %v488_v18 = vmul.f32 %v3484_v56, %v473_v59 }
  0xbf   : > { %v511_v32 = vsel %vm3291_vm2, %v502_v15, %v3304_v6  ;;  %v569_v6 = vld [vmem:[%s4972_s3 + $0x170] sm:$0xff] }
  0xc0   : > { %v446_v23 = vmax.f32 %v438_v16, 0.0  ;;  %v439_v24 = vsub.f32 %v423_v17, %v431_v10  ;;  %v503_v25 = vadd.f32 %v3492_v62, %v488_v18  ;;  %v2809_v61 = vcombine.high %v565_v11, %v569_v6  ;;  %v549_v17 = vld [vmem:[%s4972_s3 + $0xd0] sm:$0xff] }
  0xc1   : > { %v3192_v30 = vpop.eup %3191  ;;  %v2808_v4 = vcombine.low %v565_v11, %v569_v6  ;;  %v2801_v16 = vcombine.high %v557_v3, %v561_v45 }
  0xc2   : > { %v462_v33 = vadd.f32 1e-05, %v446_v23  ;;  %v447_v35 = vmax.f32 %v439_v24, 0.0  ;;  %v512_v36 = vsel %vm3291_vm2, %v503_v25, %v3306_v7  ;;  %v474_v37 = vmul.f32 %v3192_v30, %v450_v22  ;;  %v566_v7 = vld [vmem:[%s4972_s3 + $0x158] sm:$0xff]  ;;  %v541_v30 = vld [vmem:[%s4972_s3 + $0x90] sm:$0xff] }
  0xc3   : > { %v3194_v38 = vpop.eup %3193  ;;  %v3524_v39 = vpack.c.bf16 %v512_v36, %v511_v32  ;;  %v2811_v63 = vcombine.high %v566_v7, %v570_v55  ;;  %v2810_v8 = vcombine.low %v566_v7, %v570_v55  ;;  %v554_v22 = vld [vmem:[%s4972_s3 + $0xf8] sm:$0xff]  ;;  %v2800_v23 = vcombine.low %v557_v3, %v561_v45  ;;  %v537_v55 = vld [vmem:[%s4972_s3 + $0x70] sm:$0xff] }
  0xc4   : > { %3199 = vrsqrt.f32 %v462_v33  ;;  %v463_v46 = vadd.f32 1e-05, %v447_v35  ;;  %v475_v51 = vmul.f32 %v3194_v38, %v451_v5  ;;  %v489_v52 = vmul.f32 %v3484_v56, %v474_v37  ;;  %v545_v33 = vld [vmem:[%s4972_s3 + $0xb0] sm:$0xff]  ;;  %v542_v35 = vld [vmem:[%s4972_s3 + $0x98] sm:$0xff] }
  0xc5   : > { %982 = vmatmul.mubr.bf16.vlgmr.msra.gmra.mxu0 %v3524_v39  ;;  %1055 = vmatmul.mubr.bf16.vlgmr.msra.gmra.mxu1 %v3524_v39  ;;  %v454_v5 = vsub.f32 %v3340_v34, %v3479_v54  ;;  %v546_v36 = vld [vmem:[%s4972_s3 + $0xb8] sm:$0xff]  ;;  %v455_v54 = vsub.f32 %v3354_v41, %v3494_v1  ;;  %v533_v1 = vld [vmem:[%s4972_s3 + $0x50] sm:$0xff] }
  0xc6   : > { %3201 = vrsqrt.f32 %v463_v46  ;;  %1096 = vmatpush1.bf16.msra.mxu0 %v2824_v49  ;;  %1169 = vmatpush1.bf16.msra.mxu1 %v2826_v50  ;;  %v490_v58 = vmul.f32 %v3484_v56, %v475_v51  ;;  %v504_v60 = vadd.f32 %v3492_v62, %v489_v52  ;;  %v562_v49 = vld [vmem:[%s4972_s3 + $0x138] sm:$0xff]  ;;  %v2785_v52 = vcombine.high %v541_v30, %v545_v33 }
  0xc7   : > { %1097 = vmatprep.subr.bf16.mxu0 %v2817_v40  ;;  %1170 = vmatprep.subr.bf16.mxu1 %v2819_v42  ;;  %v2803_v31 = vcombine.high %v558_v47, %v562_v49  ;;  %v2802_v24 = vcombine.low %v558_v47, %v562_v49  ;;  %v2787_v7 = vcombine.high %v542_v35, %v546_v36  ;;  %v526_v47 = vld [vmem:[%s4972_s3 + $0x18] sm:$0xff] }
  0xc8   : > { %991 = vmatprep.mubr.bf16.mxu0 %v3228_v48  ;;  %1064 = vmatprep.mubr.bf16.mxu1 %v3228_v48  ;;  %v505_v44 = vadd.f32 %v3492_v62, %v490_v58  ;;  %v513_v9 = vsel %vm3291_vm2, %v504_v60, %v3312_v12  ;;  %v553_v12 = vld [vmem:[%s4972_s3 + $0xf0] sm:$0xff]  ;;  %v2784_v58 = vcombine.low %v541_v30, %v545_v33  ;;  %v530_v49 = vld [vmem:[%s4972_s3 + $0x38] sm:$0xff] }
  0xc9   : > { %v3196_v50 = vpop.eup %3195  ;;  %v2793_v28 = vcombine.high %v549_v17, %v553_v12  ;;  %v2792_v38 = vcombine.low %v549_v17, %v553_v12  ;;  %v2786_v60 = vcombine.low %v542_v35, %v546_v36  ;;  %v2777_v3 = vcombine.high %v533_v1, %v537_v55 }
  0xca   : > { %1098 = vmatpush1.bf16.msra.mxu0 %v2816_v53  ;;  %1171 = vmatpush1.bf16.msra.mxu1 %v2818_v57  ;;  %v514_v59 = vsel %vm3291_vm2, %v505_v44, %v3314_v14  ;;  %v476_v10 = vmul.f32 %v3196_v50, %v452_v43  ;;  %v550_v14 = vld [vmem:[%s4972_s3 + $0xd8] sm:$0xff]  ;;  %v525_v44 = vld [vmem:[%s4972_s3 + $0x10] sm:$0xff]  ;;  %v2776_v50 = vcombine.low %v533_v1, %v537_v55 }
  0xcb   : > { %v3198_v13 = vpop.eup %3197  ;;  %1099 = vmatprep.subr.bf16.mxu0 %v2809_v61  ;;  %v3574_v15 = vpack.c.bf16 %v514_v59, %v513_v9  ;;  %1172 = vmatprep.subr.bf16.mxu1 %v2811_v63  ;;  %v2795_v29 = vcombine.high %v550_v14, %v554_v22  ;;  %v2794_v40 = vcombine.low %v550_v14, %v554_v22  ;;  %v538_v57 = vld [vmem:[%s4972_s3 + $0x78] sm:$0xff]  ;;  %v3691_v22 = vsub.s32 3, %v590_v2 }
  0xcc   : > { %v477_v18 = vmul.f32 %v3198_v13, %v453_v26  ;;  %v491_v20 = vmul.f32 %v3484_v56, %v476_v10  ;;  %v2771_v59 = vcombine.high %v526_v47, %v530_v49  ;;  %v2770_v13 = vcombine.low %v526_v47, %v530_v49 }
  0xcd   : > { %992 = vmatmul.mubr.bf16.gmra.mxu0 %v3574_v15  ;;  %1065 = vmatmul.mubr.bf16.gmra.mxu1 %v3574_v15 }
  0xce   : > { %1100 = vmatpush1.bf16.msra.mxu0 %v2808_v4  ;;  %1173 = vmatpush1.bf16.msra.mxu1 %v2810_v8  ;;  %v492_v25 = vmul.f32 %v3484_v56, %v477_v18  ;;  %v506_v27 = vadd.f32 %v3492_v62, %v491_v20 }
  0xcf   : > { %1101 = vmatprep.subr.bf16.mxu0 %v2801_v16  ;;  %1174 = vmatprep.subr.bf16.mxu1 %v2803_v31 }
  0xd0   : > { %1001 = vmatprep.mubr.bf16.mxu0 %v3228_v48  ;;  %1074 = vmatprep.mubr.bf16.mxu1 %v3228_v48  ;;  %v507_v32 = vadd.f32 %v3492_v62, %v492_v25  ;;  %v515_v42 = vsel %vm3291_vm2, %v506_v27, %v3320_v19 }
  0xd1   : > { %v3200_v37 = vpop.eup %3199 }
  0xd2   : > { %1102 = vmatpush1.bf16.msra.mxu0 %v2800_v23  ;;  %1175 = vmatpush1.bf16.msra.mxu1 %v2802_v24  ;;  %v516_v11 = vsel %vm3291_vm2, %v507_v32, %v3322_v21  ;;  %v478_v46 = vmul.f32 %v3200_v37, %v454_v5  ;;  %v534_v21 = vld [vmem:[%s4972_s3 + $0x58] sm:$0xff]  ;;  %v3703_v32 = vsub.s32 6, %v590_v2 }
  0xd3   : > { %v3202_v6 = vpop.eup %3201  ;;  %1103 = vmatprep.subr.bf16.mxu0 %v2793_v28  ;;  %v521_v51 = vpack.c.bf16 %v516_v11, %v515_v42  ;;  %1176 = vmatprep.subr.bf16.mxu1 %v2795_v29  ;;  %v2779_v43 = vcombine.high %v534_v21, %v538_v57  ;;  %v2778_v4 = vcombine.low %v534_v21, %v538_v57  ;;  %v3695_v29 = vsub.s32 4, %v590_v2 }
  0xd4   : > { %v479_v19 = vmul.f32 %v3202_v6, %v455_v54  ;;  %v493_v53 = vmul.f32 %v3484_v56, %v478_v46  ;;  %v3717_v42 = vsub.s32 5, %v590_v2 }
  0xd5   : > { %1002 = vmatmul.mubr.bf16.gmra.mxu0 %v521_v51  ;;  %1075 = vmatmul.mubr.bf16.gmra.mxu1 %v521_v51 }
  0xd6   : > { %1104 = vmatpush1.bf16.msra.mxu0 %v2792_v38  ;;  %1177 = vmatpush1.bf16.msra.mxu1 %v2794_v40  ;;  %v494_v61 = vmul.f32 %v3484_v56, %v479_v19  ;;  %v508_v63 = vadd.f32 %v3492_v62, %v493_v53  ;;  %v529_v56 = vld [vmem:[%s4972_s3 + $0x30] sm:$0xff] }
  0xd7   : > { %1105 = vmatprep.subr.bf16.mxu0 %v2785_v52  ;;  %1178 = vmatprep.subr.bf16.mxu1 %v2787_v7  ;;  %v2769_v9 = vcombine.high %v525_v44, %v529_v56  ;;  %v2768_v10 = vcombine.low %v525_v44, %v529_v56  ;;  %v3725_v7 = vsub.s32 7, %v590_v2 }
  0xd8   : > { %1011 = vmatprep.mubr.bf16.mxu0 %v3228_v48  ;;  %1084 = vmatprep.mubr.bf16.mxu1 %v3228_v48  ;;  %v509_v45 = vadd.f32 %v3492_v62, %v494_v61  ;;  %v517_v26 = vsel %vm3291_vm2, %v508_v63, %v3340_v34  ;;  %v3667_v34 = vsub.s32 1, %v590_v2 }
  0xda   : > { %1106 = vmatpush1.bf16.msra.mxu0 %v2784_v58  ;;  %1179 = vmatpush1.bf16.msra.mxu1 %v2786_v60  ;;  %v518_v62 = vsel %vm3291_vm2, %v509_v45, %v3354_v41  ;;  %v3669_v41 = vsub.s32 0, %v590_v2 }
  0xdb   : > { %1107 = vmatprep.subr.bf16.mxu0 %v2777_v3  ;;  %v522_v8 = vpack.c.bf16 %v518_v62, %v517_v26  ;;  %1180 = vmatprep.subr.bf16.mxu1 %v2779_v43 }
  0xdd   : > { %1012 = vmatmul.mubr.bf16.gmra.mxu0 %v522_v8  ;;  %1085 = vmatmul.mubr.bf16.gmra.mxu1 %v522_v8 }
  0xde   : > { %1108 = vmatpush1.bf16.msra.mxu0 %v2776_v50  ;;  %1181 = vmatpush1.bf16.msra.mxu1 %v2778_v4 }
  0xdf   : > { %1109 = vmatprep.subr.bf16.mxu0 %v2769_v9  ;;  %1182 = vmatprep.subr.bf16.mxu1 %v2771_v59 }
  0xe0   : > { %1127 = vmatprep.mubr.bf16.mxu0 %v3228_v48  ;;  %1200 = vmatprep.mubr.bf16.mxu1 %v3228_v48 }
  0xe2   : > { %1110 = vmatpush1.bf16.msra.mxu0 %v2768_v10  ;;  %1183 = vmatpush1.bf16.msra.mxu1 %v2770_v13 }
  0xe5   : > { %1128 = vmatmul.mubr.bf16.vlgmr.msra.gmra.mxu0 %v3524_v39  ;;  %1201 = vmatmul.mubr.bf16.vlgmr.msra.gmra.mxu1 %v3524_v39  ;;  %v587_v39 = vld [vmem:[%s4973_s4] sm:$0xff] }
  0xe6   : > { %1137 = vmatprep.mubr.bf16.mxu0 %v3228_v48  ;;  %1210 = vmatprep.mubr.bf16.mxu1 %v3228_v48  ;;  %v3678_v16 = vrot.slane %v587_v39, %v3669_v41  ;;  %v3713_v37 = vrot.slane %v587_v39, %v3691_v22  ;;  %v3723_v52 = vrot.slane %v587_v39, %v3695_v29 }
  0xe7   : > { %v3736_v53 = vrot.slane %v587_v39, %v3703_v32  ;;  %v3752_v45 = vrot.slane %v587_v39, %v3717_v42  ;;  %v3760_v62 = vrot.slane %v587_v39, %v3725_v7 }
  0xed   : > { %1138 = vmatmul.mubr.bf16.gmra.mxu0 %v3574_v15  ;;  %1211 = vmatmul.mubr.bf16.gmra.mxu1 %v3574_v15  ;;  %v3675_v15 = vrot.slane %v587_v39, %v3667_v34 }
  0xee   : > { %1147 = vmatprep.mubr.bf16.mxu0 %v3228_v48  ;;  %1220 = vmatprep.mubr.bf16.mxu1 %v3228_v48 }
  0xf5   : > { %1148 = vmatmul.mubr.bf16.gmra.mxu0 %v521_v51  ;;  %1221 = vmatmul.mubr.bf16.gmra.mxu1 %v521_v51 }
  0xf6   : > { %1157 = vmatprep.mubr.bf16.mxu0 %v3228_v48  ;;  %1230 = vmatprep.mubr.bf16.mxu1 %v3228_v48  ;;  %v3680_v48 = vsub.s32 2, %v590_v2 }
  0xf8   : > { %v3689_v14 = vrot.slane %v587_v39, %v3680_v48 }
  0xfd   : > { %1158 = vmatmul.mubr.bf16.gmra.mxu0 %v522_v8  ;;  %1231 = vmatmul.mubr.bf16.gmra.mxu1 %v522_v8 }
 0x185   : > { %v983_v31 = vpop.f32.mrf.mxu0  ;;  %v1056_v17 = vpop.f32.mrf.mxu1 }
 0x186   : > { %v3686_v20 = vadd.f32 %v983_v31, %v3678_v16  ;;  %v3708_v35 = vadd.f32 %v1056_v17, %v3689_v14 }
 0x187   : > { %v985_v12 = vpop.f32.mrf.mxu0  ;;  %v1058_v0 = vpop.f32.mrf.mxu1 }
 0x188   : > { %v3683_v18 = vadd.f32 %v985_v12, %v3675_v15  ;;  %v1313_v33 = vmul.f32 %v3686_v20, %v3686_v20  ;;  %v1315_v21 = vmul.f32 %v3708_v35, %v3708_v35  ;;  %v3741_v57 = vadd.f32 %v1058_v0, %v3713_v37 }
 0x189   : > { %v987_v23 = vpop.f32.mrf.mxu0  ;;  %v1060_v24 = vpop.f32.mrf.mxu1 }
 0x18a   : > { %v1314_v25 = vmul.f32 %v3683_v18, %v3683_v18  ;;  %v3698_v30 = vadd.f32 %v987_v23, %v3678_v16  ;;  %v1241_v36 = vadd.f32 %v3683_v18, %v3686_v20  ;;  %v3720_v46 = vadd.f32 %v1060_v24, %v3689_v14 }
 0x18b   : > { %v989_v27 = vpop.f32.mrf.mxu0  ;;  %v1062_v28 = vpop.f32.mrf.mxu1  ;;  %v1316_v13 = vmul.f32 %v3741_v57, %v3741_v57 }
 0x18c   : > { %v3701_v5 = vadd.f32 %v989_v27, %v3675_v15  ;;  %v1377_v11 = vadd.f32 %v1314_v25, %v1313_v33  ;;  %v1321_v1 = vmul.f32 %v3698_v30, %v3698_v30  ;;  %v1242_v58 = vadd.f32 %v1241_v36, %v3708_v35 }
 0x18d   : > { %v993_v54 = vpop.f32.mrf.mxu0  ;;  %v1066_v38 = vpop.f32.mrf.mxu1  ;;  %v3747_v43 = vadd.f32 %v1062_v28, %v3713_v37  ;;  %v1323_v47 = vmul.f32 %v3720_v46, %v3720_v46 }
 0x18e   : > { %v1322_v40 = vmul.f32 %v3701_v5, %v3701_v5  ;;  %v3730_v55 = vadd.f32 %v993_v54, %v3678_v16  ;;  %v1250_v60 = vadd.f32 %v3701_v5, %v3698_v30  ;;  %v1378_v56 = vadd.f32 %v1377_v11, %v1315_v21 }
 0x18f   : > { %v995_v6 = vpop.f32.mrf.mxu0  ;;  %v1068_v51 = vpop.f32.mrf.mxu1  ;;  %v3765_v8 = vadd.f32 %v1066_v38, %v3689_v14  ;;  %v3773_v10 = vadd.f32 %v1242_v58, %v3741_v57  ;;  %v1324_v12 = vmul.f32 %v3747_v43, %v3747_v43 }
 0x190   : > { %5061 = vst [vmem:[#allocation2_spill] sm:$0xff] %v3730_v55  ;;  %v3733_v19 = vadd.f32 %v995_v6, %v3675_v15  ;;  %v1386_v3 = vadd.f32 %v1322_v40, %v1321_v1  ;;  %v1329_v4 = vmul.f32 %v3730_v55, %v3730_v55  ;;  %v1251_v2 = vadd.f32 %v1250_v60, %v3720_v46 }
 0x191   : > { %v997_v61 = vpop.f32.mrf.mxu0  ;;  %v1070_v63 = vpop.f32.mrf.mxu1  ;;  %5063 = vst [vmem:[#allocation4_spill] sm:$0xff] %v3765_v8  ;;  %v3779_v39 = vadd.f32 %v1068_v51, %v3713_v37  ;;  %v3785_v25 = vadd.f32 %v1378_v56, %v1316_v13  ;;  %v1331_v38 = vmul.f32 %v3765_v8, %v3765_v8 }
 0x192   : > { %v1330_v44 = vmul.f32 %v3733_v19, %v3733_v19  ;;  %v3757_v49 = vadd.f32 %v997_v61, %v3678_v16  ;;  %v1259_v9 = vadd.f32 %v3733_v19, %v3730_v55  ;;  %v1387_v0 = vadd.f32 %v1386_v3, %v1323_v47 }
 0x193   : > { %v999_v50 = vpop.f32.mrf.mxu0  ;;  %v1072_v26 = vpop.f32.mrf.mxu1  ;;  %v3790_v28 = vadd.f32 %v1070_v63, %v3689_v14  ;;  %v3804_v51 = vadd.f32 %v1251_v2, %v3747_v43  ;;  %v1332_v1 = vmul.f32 %v3779_v39, %v3779_v39 }
 0x194   : > { %5062 = vst [vmem:[#allocation3_spill] sm:$0xff] %v3757_v49  ;;  %v3770_v59 = vadd.f32 %v999_v50, %v3675_v15  ;;  %v1395_v23 = vadd.f32 %v1330_v44, %v1329_v4  ;;  %v1337_v27 = vmul.f32 %v3757_v49, %v3757_v49  ;;  %v1260_v40 = vadd.f32 %v1259_v9, %v3765_v8 }
 0x195   : > { %v1003_v31 = vpop.f32.mrf.mxu0  ;;  %v1076_v17 = vpop.f32.mrf.mxu1  ;;  %5065 = vst [vmem:[#allocation6_spill] sm:$0xff] %v3790_v28  ;;  %v3809_v58 = vadd.f32 %v1072_v26, %v3713_v37  ;;  %v3811_v63 = vadd.f32 %v1387_v0, %v1324_v12  ;;  %v1339_v47 = vmul.f32 %v3790_v28, %v3790_v28 }
 0x196   : > { %5064 = vst [vmem:[#allocation5_spill] sm:$0xff] %v3770_v59  ;;  %v1338_v24 = vmul.f32 %v3770_v59, %v3770_v59  ;;  %v3793_v33 = vadd.f32 %v1003_v31, %v3678_v16  ;;  %v1268_v11 = vadd.f32 %v3770_v59, %v3757_v49  ;;  %v1396_v3 = vadd.f32 %v1395_v23, %v1331_v38 }
 0x197   : > { %v1005_v36 = vpop.f32.mrf.mxu0  ;;  %v1078_v54 = vpop.f32.mrf.mxu1  ;;  %5068 = vst [vmem:[#allocation9_spill] sm:$0xff] %v3809_v58  ;;  %v3822_v26 = vadd.f32 %v1076_v17, %v3689_v14  ;;  %v3828_v2 = vadd.f32 %v1260_v40, %v3779_v39  ;;  %v1340_v17 = vmul.f32 %v3809_v58, %v3809_v58 }
 0x198   : > { %5066 = vst [vmem:[#allocation7_spill] sm:$0xff] %v3793_v33  ;;  %v3801_v6 = vadd.f32 %v1005_v36, %v3675_v15  ;;  %v1404_v21 = vadd.f32 %v1338_v24, %v1337_v27  ;;  %v1345_v50 = vmul.f32 %v3793_v33, %v3793_v33  ;;  %v1269_v31 = vadd.f32 %v1268_v11, %v3790_v28 }
 0x199   : > { %v1007_v60 = vpop.f32.mrf.mxu0  ;;  %v1080_v61 = vpop.f32.mrf.mxu1  ;;  %5069 = vst [vmem:[#allocation10_spill] sm:$0xff] %v3822_v26  ;;  %v3832_v12 = vadd.f32 %v1078_v54, %v3713_v37  ;;  %v3842_v40 = vadd.f32 %v1396_v3, %v1332_v1 }
 0x19a   : > { %5067 = vst [vmem:[#allocation8_spill] sm:$0xff] %v3801_v6  ;;  %v1277_v44 = vadd.f32 %v3801_v6, %v3793_v33  ;;  %v1346_v56 = vmul.f32 %v3801_v6, %v3801_v6  ;;  %v3825_v4 = vadd.f32 %v1007_v60, %v3678_v16  ;;  %v1405_v23 = vadd.f32 %v1404_v21, %v1339_v47 }
 0x19b   : > { %v1009_v9 = vpop.f32.mrf.mxu0  ;;  %v1082_v13 = vpop.f32.mrf.mxu1  ;;  %5071 = vst [vmem:[#allocation12_spill] sm:$0xff] %v3832_v12  ;;  %v3840_v27 = vadd.f32 %v1080_v61, %v3689_v14  ;;  %v1348_v47 = vmul.f32 %v3832_v12, %v3832_v12 }
 0x19c   : > { %5070 = vst [vmem:[#allocation11_spill] sm:$0xff] %v3825_v4  ;;  %v3835_v0 = vadd.f32 %v1009_v9, %v3675_v15  ;;  %v1413_v24 = vadd.f32 %v1346_v56, %v1345_v50  ;;  %v1278_v11 = vadd.f32 %v1277_v44, %v3822_v26  ;;  %v1353_v54 = vmul.f32 %v3825_v4, %v3825_v4 }
 0x19d   : > { %5073 = vst [vmem:[#allocation14_spill] sm:$0xff] %v3840_v27  ;;  %v1013_v36 = vpop.f32.mrf.mxu0  ;;  %v1086_v38 = vpop.f32.mrf.mxu1  ;;  %v1347_v9 = vmul.f32 %v3822_v26, %v3822_v26  ;;  %v3860_v56 = vadd.f32 %v1269_v31, %v3809_v58  ;;  %v3867_v33 = vadd.f32 %v1405_v23, %v1340_v17 }
 0x19e   : > { %5072 = vst [vmem:[#allocation13_spill] sm:$0xff] %v3835_v0  ;;  %v1354_v60 = vmul.f32 %v3835_v0, %v3835_v0  ;;  %v1286_v21 = vadd.f32 %v3835_v0, %v3825_v4  ;;  %v3854_v61 = vadd.f32 %v1013_v36, %v3678_v16  ;;  %v3857_v1 = vadd.f32 %v1086_v38, %v3689_v14 }
 0x19f   : > { %v1015_v3 = vpop.f32.mrf.mxu0  ;;  %v1088_v44 = vpop.f32.mrf.mxu1  ;;  %v1414_v4 = vadd.f32 %v1413_v24, %v1347_v9  ;;  %v1355_v36 = vmul.f32 %v3840_v27, %v3840_v27  ;;  %v3872_v38 = vadd.f32 %v1082_v13, %v3713_v37  ;;  %v3875_v31 = vadd.f32 %v1278_v11, %v3832_v12 }
 0x1a0   : > { %5074 = vst [vmem:[#allocation15_spill] sm:$0xff] %v3854_v61  ;;  %5075 = vst [vmem:[#allocation16_spill] sm:$0xff] %v3857_v1  ;;  %v1422_v50 = vadd.f32 %v1354_v60, %v1353_v54  ;;  %v3865_v26 = vadd.f32 %v1015_v3, %v3675_v15  ;;  %v1361_v54 = vmul.f32 %v3854_v61, %v3854_v61 }
 0x1a1   : > { %5077 = vst [vmem:[#allocation18_spill] sm:$0xff] %v3872_v38  ;;  %v1017_v0 = vpop.f32.mrf.mxu0  ;;  %v1090_v6 = vpop.f32.mrf.mxu1  ;;  %v1287_v23 = vadd.f32 %v1286_v21, %v3840_v27  ;;  %v1363_v13 = vmul.f32 %v3857_v1, %v3857_v1  ;;  %v3887_v24 = vadd.f32 %v1088_v44, %v3713_v37  ;;  %v3898_v21 = vadd.f32 %v1414_v4, %v1348_v47 }
 0x1a2   : > { %5076 = vst [vmem:[#allocation17_spill] sm:$0xff] %v3865_v26  ;;  %v1295_v60 = vadd.f32 %v3865_v26, %v3854_v61  ;;  %v1362_v17 = vmul.f32 %v3865_v26, %v3865_v26  ;;  %v3890_v11 = vadd.f32 %v1017_v0, %v3678_v16  ;;  %v1423_v12 = vadd.f32 %v1422_v50, %v1355_v36 }
 0x1a3   : > { %5078 = vst [vmem:[#allocation19_spill] sm:$0xff] %v3887_v24  ;;  %v1019_v9 = vpop.f32.mrf.mxu0  ;;  %v1092_v3 = vpop.f32.mrf.mxu1  ;;  %v3893_v61 = vadd.f32 %v1090_v6, %v3689_v14  ;;  %v1356_v27 = vmul.f32 %v3872_v38, %v3872_v38  ;;  %v3913_v4 = vadd.f32 %v1287_v23, %v3872_v38  ;;  %v1364_v47 = vmul.f32 %v3887_v24, %v3887_v24 }
 0x1a4   : > { %5079 = vst [vmem:[#allocation20_spill] sm:$0xff] %v3890_v11  ;;  %v1431_v28 = vadd.f32 %v1362_v17, %v1361_v54  ;;  %v3896_v26 = vadd.f32 %v1019_v9, %v3675_v15  ;;  %v1296_v44 = vadd.f32 %v1295_v60, %v3857_v1  ;;  %v3904_v16 = vadd.f32 %v1092_v3, %v3713_v37 }
 0x1a5   : > { %5080 = vst [vmem:[#allocation21_spill] sm:$0xff] %v3893_v61  ;;  %v1129_v0 = vpop.f32.mrf.mxu0  ;;  %v1202_v49 = vpop.f32.mrf.mxu1  ;;  %v1369_v14 = vmul.f32 %v3890_v11, %v3890_v11  ;;  %v3923_v60 = vadd.f32 %v1423_v12, %v1356_v27  ;;  %v1371_v17 = vmul.f32 %v3893_v61, %v3893_v61 }
 0x1a6   : > { %5081 = vst [vmem:[#allocation22_spill] sm:$0xff] %v3896_v26  ;;  %5082 = vst [vmem:[#allocation23_spill] sm:$0xff] %v3904_v16  ;;  %v1432_v50 = vadd.f32 %v1431_v28, %v1363_v13  ;;  %v1304_v15 = vadd.f32 %v3896_v26, %v3890_v11  ;;  %v1370_v6 = vmul.f32 %v3896_v26, %v3896_v26 }
 0x1a7   : > { %v3918_v37 = vadd.f32 %v1129_v0, %v3723_v52  ;;  %v3921_v28 = vadd.f32 %v1202_v49, %v3736_v53  ;;  %v1131_v36 = vpop.f32.mrf.mxu0  ;;  %v1204_v54 = vpop.f32.mrf.mxu1  ;;  %v3931_v9 = vadd.f32 %v1296_v44, %v3887_v24  ;;  %v1372_v3 = vmul.f32 %v3904_v16, %v3904_v16 }
 0x1a8   : > { %v1440_v13 = vadd.f32 %v1370_v6, %v1369_v14  ;;  %v3928_v23 = vadd.f32 %v1131_v36, %v3752_v45  ;;  %v3939_v1 = vadd.f32 %v1432_v50, %v1364_v47  ;;  %v1305_v14 = vadd.f32 %v1304_v15, %v3893_v61 }
 0x1a9   : > { %5083 = vst [vmem:[#allocation24_spill] sm:$0xff] %v3918_v37  ;;  %5084 = vst [vmem:[#allocation25_spill] sm:$0xff] %v3921_v28  ;;  %v1244_v49 = vadd.f32 %v3773_v10, %v3918_v37  ;;  %v1317_v12 = vmul.f32 %v3918_v37, %v3918_v37  ;;  %v1133_v27 = vpop.f32.mrf.mxu0  ;;  %v1206_v0 = vpop.f32.mrf.mxu1  ;;  %v1319_v10 = vmul.f32 %v3921_v28, %v3921_v28 }
 0x1aa   : > { %v1318_v6 = vmul.f32 %v3928_v23, %v3928_v23  ;;  %v3945_v44 = vadd.f32 %v1133_v27, %v3723_v52  ;;  %v3952_v24 = vadd.f32 %v1204_v54, %v3760_v62  ;;  %v1441_v26 = vadd.f32 %v1440_v13, %v1371_v17 }
 0x1ab   : > { %v1380_v36 = vadd.f32 %v3785_v25, %v1317_v12  ;;  %v1245_v11 = vadd.f32 %v1244_v49, %v3928_v23  ;;  %v1135_v50 = vpop.f32.mrf.mxu0  ;;  %v1208_v47 = vpop.f32.mrf.mxu1  ;;  %v3962_v25 = vadd.f32 %v1206_v0, %v3736_v53  ;;  %v3976_v0 = vadd.f32 %v1305_v14, %v3904_v16 }
 0x1ac   : > { %5085 = vst [vmem:[#allocation26_spill] sm:$0xff] %v3945_v44  ;;  %v1253_v15 = vadd.f32 %v3804_v51, %v3945_v44  ;;  %v1325_v27 = vmul.f32 %v3945_v44, %v3945_v44  ;;  %v3959_v61 = vadd.f32 %v1135_v50, %v3752_v45  ;;  %v3965_v49 = vadd.f32 %v1208_v47, %v3760_v62 }
 0x1ad   : > { %5086 = vst [vmem:[#allocation27_spill] sm:$0xff] %v3962_v25  ;;  %v1139_v54 = vpop.f32.mrf.mxu0  ;;  %v1212_v12 = vpop.f32.mrf.mxu1  ;;  %v1246_v38 = vadd.f32 %v1245_v11, %v3921_v28  ;;  %v1381_v17 = vadd.f32 %v1380_v36, %v1318_v6  ;;  %v1320_v11 = vmul.f32 %v3952_v24, %v3952_v24  ;;  %v1327_v14 = vmul.f32 %v3962_v25, %v3962_v25  ;;  %v5133_v28 = vld [vmem:[#allocation7_spill] sm:$0xff] }
 0x1ae   : > { %5087 = vst [vmem:[#allocation28_spill] sm:$0xff] %v3965_v49  ;;  %v1389_v13 = vadd.f32 %v3811_v63, %v1325_v27  ;;  %v1254_v51 = vadd.f32 %v1253_v15, %v3959_v61  ;;  %v1326_v58 = vmul.f32 %v3959_v61, %v3959_v61  ;;  %v3973_v50 = vadd.f32 %v1139_v54, %v3723_v52 }
 0x1af   : > { %v1141_v47 = vpop.f32.mrf.mxu0  ;;  %v1214_v59 = vpop.f32.mrf.mxu1  ;;  %v1247_v8 = vadd.f32 %v1246_v38, %v3952_v24  ;;  %v1382_v6 = vadd.f32 %v1381_v17, %v1319_v10  ;;  %v3981_v63 = vadd.f32 %v1441_v26, %v1372_v3  ;;  %v3993_v38 = vadd.f32 %v1212_v12, %v3736_v53 }
 0x1b0   : > { %5088 = vst [vmem:[#allocation29_spill] sm:$0xff] %v3973_v50  ;;  %v1262_v36 = vadd.f32 %v3828_v2, %v3973_v50  ;;  %v1333_v15 = vmul.f32 %v3973_v50, %v3973_v50  ;;  %v3988_v27 = vadd.f32 %v1141_v47, %v3752_v45  ;;  %v1255_v26 = vadd.f32 %v1254_v51, %v3962_v25  ;;  %v5126_v25 = vld [vmem:[#allocation3_spill] sm:$0xff] }
 0x1b1   : > { %5090 = vst [vmem:[#allocation31_spill] sm:$0xff] %v3993_v38  ;;  %1248 = vadd.xlane.f32.xlu0 %v1247_v8  ;;  %v1143_v54 = vpop.f32.mrf.mxu0  ;;  %v1216_v10 = vpop.f32.mrf.mxu1  ;;  %v1390_v3 = vadd.f32 %v1389_v13, %v1326_v58  ;;  %v1383_v16 = vadd.f32 %v1382_v6, %v1320_v11  ;;  %v1328_v47 = vmul.f32 %v3965_v49, %v3965_v49 }
 0x1b2   : > { %5089 = vst [vmem:[#allocation30_spill] sm:$0xff] %v3988_v27  ;;  %v1263_v2 = vadd.f32 %v1262_v36, %v3988_v27  ;;  %v3998_v17 = vadd.f32 %v1143_v54, %v3723_v52  ;;  %v1398_v50 = vadd.f32 %v3842_v40, %v1333_v15  ;;  %v1334_v12 = vmul.f32 %v3988_v27, %v3988_v27 }
 0x1b3   : > { %v1145_v8 = vpop.f32.mrf.mxu0  ;;  %v1218_v55 = vpop.f32.mrf.mxu1  ;;  %v1256_v44 = vadd.f32 %v1255_v26, %v3965_v49  ;;  %v1391_v51 = vadd.f32 %v1390_v3, %v1327_v14  ;;  %v4007_v58 = vadd.f32 %v1214_v59, %v3760_v62  ;;  %v1335_v40 = vmul.f32 %v3993_v38, %v3993_v38 }
 0x1b4   : > { %5091 = vst [vmem:[#allocation32_spill] sm:$0xff] %v3998_v17  ;;  %v1271_v13 = vadd.f32 %v3860_v56, %v3998_v17  ;;  %v1341_v11 = vmul.f32 %v3998_v17, %v3998_v17  ;;  %v4014_v6 = vadd.f32 %v1145_v8, %v3752_v45  ;;  %v4019_v36 = vadd.f32 %v1216_v10, %v3736_v53 }
 0x1b5   : > { %5092 = vst [vmem:[#allocation33_spill] sm:$0xff] %v4007_v58  ;;  %1257 = vadd.xlane.f32.xlu1 %v1256_v44  ;;  %1384 = vadd.xlane.f32.xlu0 %v1383_v16  ;;  %v1149_v15 = vpop.f32.mrf.mxu0  ;;  %v1222_v59 = vpop.f32.mrf.mxu1  ;;  %v1264_v14 = vadd.f32 %v1263_v2, %v3993_v38  ;;  %v4024_v54 = vadd.f32 %v1218_v55, %v3760_v62 }
 0x1b6   : > { %5093 = vst [vmem:[#allocation34_spill] sm:$0xff] %v4014_v6  ;;  %5094 = vst [vmem:[#allocation35_spill] sm:$0xff] %v4019_v36  ;;  %v1272_v56 = vadd.f32 %v1271_v13, %v4014_v6  ;;  %v4027_v26 = vadd.f32 %v1149_v15, %v3723_v52  ;;  %v1392_v3 = vadd.f32 %v1391_v51, %v1328_v47 }
 0x1b7   : > { %5095 = vst [vmem:[#allocation36_spill] sm:$0xff] %v4024_v54  ;;  %v1407_v8 = vadd.f32 %v3867_v33, %v1341_v11  ;;  %v1342_v10 = vmul.f32 %v4014_v6, %v4014_v6  ;;  %v1151_v44 = vpop.f32.mrf.mxu0  ;;  %v1224_v16 = vpop.f32.mrf.mxu1  ;;  %v1265_v17 = vadd.f32 %v1264_v14, %v4007_v58  ;;  %v1399_v27 = vadd.f32 %v1398_v50, %v1334_v12 }
 0x1b8   : > { %5096 = vst [vmem:[#allocation37_spill] sm:$0xff] %v4027_v26  ;;  %v1280_v2 = vadd.f32 %v3875_v31, %v4027_v26  ;;  %v1349_v55 = vmul.f32 %v4027_v26, %v4027_v26  ;;  %v4038_v13 = vadd.f32 %v1151_v44, %v3752_v45  ;;  %v1336_v33 = vmul.f32 %v4007_v58, %v4007_v58 }
 0x1b9   : > { %v1343_v47 = vmul.f32 %v4019_v36, %v4019_v36  ;;  %1393 = vadd.xlane.f32.xlu1 %v1392_v3  ;;  %1266 = vadd.xlane.f32.xlu0 %v1265_v17  ;;  %v1153_v51 = vpop.f32.mrf.mxu0  ;;  %v1226_v11 = vpop.f32.mrf.mxu1  ;;  %v1273_v50 = vadd.f32 %v1272_v56, %v4019_v36  ;;  %v1400_v12 = vadd.f32 %v1399_v27, %v1335_v40 }
 0x1ba   : > { %5097 = vst [vmem:[#allocation38_spill] sm:$0xff] %v4038_v13  ;;  %v4046_v31 = vadd.f32 %v1222_v59, %v3736_v53  ;;  %v1281_v15 = vadd.f32 %v1280_v2, %v4038_v13  ;;  %v4050_v14 = vadd.f32 %v1153_v51, %v3723_v52  ;;  %v1344_v44 = vmul.f32 %v4024_v54, %v4024_v54 }
 0x1bb   : > { %v4055_v26 = vadd.f32 %v1224_v16, %v3760_v62  ;;  %v1155_v17 = vpop.f32.mrf.mxu0  ;;  %v1228_v3 = vpop.f32.mrf.mxu1  ;;  %v1274_v6 = vadd.f32 %v1273_v50, %v4024_v54  ;;  %v1401_v56 = vadd.f32 %v1400_v12, %v1336_v33  ;;  %v1408_v27 = vadd.f32 %v1407_v8, %v1342_v10  ;;  %v5134_v54 = vld [vmem:[#allocation10_spill] sm:$0xff] }
 0x1bc   : > { %5098 = vst [vmem:[#allocation39_spill] sm:$0xff] %v4046_v31  ;;  %5099 = vst [vmem:[#allocation40_spill] sm:$0xff] %v4050_v14  ;;  %v1416_v40 = vadd.f32 %v3898_v21, %v1349_v55  ;;  %v1289_v59 = vadd.f32 %v3913_v4, %v4050_v14  ;;  %v1357_v2 = vmul.f32 %v4050_v14, %v4050_v14 }
 0x1bd   : > { %5100 = vst [vmem:[#allocation41_spill] sm:$0xff] %v4055_v26  ;;  %v4064_v51 = vadd.f32 %v1155_v17, %v3752_v45  ;;  %v1350_v16 = vmul.f32 %v4038_v13, %v4038_v13  ;;  %1275 = vadd.xlane.f32.xlu1 %v1274_v6  ;;  %1402 = vadd.xlane.f32.xlu0 %v1401_v56  ;;  %v1159_v36 = vpop.f32.mrf.mxu0  ;;  %v1232_v50 = vpop.f32.mrf.mxu1 }
 0x1be   : > { %v1409_v33 = vadd.f32 %v1408_v27, %v1343_v47  ;;  %v1282_v8 = vadd.f32 %v1281_v15, %v4046_v31  ;;  %v1351_v21 = vmul.f32 %v4046_v31, %v4046_v31  ;;  %v4072_v4 = vadd.f32 %v1226_v11, %v3736_v53 }
 0x1bf   : > { %5101 = vst [vmem:[#allocation42_spill] sm:$0xff] %v4064_v51  ;;  %v1290_v10 = vadd.f32 %v1289_v59, %v4064_v51  ;;  %v4076_v55 = vadd.f32 %v1159_v36, %v3723_v52  ;;  %v1425_v12 = vadd.f32 %v3923_v60, %v1357_v2  ;;  %v4080_v6 = vadd.f32 %v1228_v3, %v3760_v62  ;;  %v1161_v17 = vpop.f32.mrf.mxu0  ;;  %v1234_v47 = vpop.f32.mrf.mxu1 }
 0x1c0   : > { %5102 = vst [vmem:[#allocation43_spill] sm:$0xff] %v4072_v4  ;;  %v1410_v56 = vadd.f32 %v1409_v33, %v1344_v44  ;;  %v1283_v15 = vadd.f32 %v1282_v8, %v4055_v26  ;;  %v1358_v27 = vmul.f32 %v4064_v51, %v4064_v51  ;;  %v4090_v59 = vadd.f32 %v1161_v17, %v3752_v45 }
 0x1c1   : > { %5103 = vst [vmem:[#allocation44_spill] sm:$0xff] %v4076_v55  ;;  %5104 = vst [vmem:[#allocation45_spill] sm:$0xff] %v4080_v6  ;;  %v1298_v11 = vadd.f32 %v3931_v9, %v4076_v55  ;;  %v1365_v36 = vmul.f32 %v4076_v55, %v4076_v55  ;;  %v4093_v60 = vadd.f32 %v1232_v50, %v3736_v53  ;;  %v1163_v44 = vpop.f32.mrf.mxu0  ;;  %v1236_v55 = vpop.f32.mrf.mxu1 }
 0x1c2   : > { %5105 = vst [vmem:[#allocation46_spill] sm:$0xff] %v4090_v59  ;;  %1411 = vadd.xlane.f32.xlu1 %v1410_v56  ;;  %1284 = vadd.xlane.f32.xlu0 %v1283_v15  ;;  %v1291_v3 = vadd.f32 %v1290_v10, %v4072_v4  ;;  %v1417_v2 = vadd.f32 %v1416_v40, %v1350_v16 }
 0x1c3   : > { %5106 = vst [vmem:[#allocation47_spill] sm:$0xff] %v4093_v60  ;;  %v1359_v33 = vmul.f32 %v4072_v4, %v4072_v4  ;;  %v1299_v9 = vadd.f32 %v1298_v11, %v4090_v59  ;;  %v4100_v8 = vadd.f32 %v1163_v44, %v3723_v52  ;;  %v1352_v17 = vmul.f32 %v4055_v26, %v4055_v26  ;;  %v1165_v15 = vpop.f32.mrf.mxu0  ;;  %v5139_v26 = vld [vmem:[#allocation14_spill] sm:$0xff] }
 0x1c4   : > { %v1434_v50 = vadd.f32 %v3939_v1, %v1365_v36  ;;  %v1366_v56 = vmul.f32 %v4090_v59, %v4090_v59  ;;  %v1292_v40 = vadd.f32 %v1291_v3, %v4080_v6  ;;  %v1418_v16 = vadd.f32 %v1417_v2, %v1351_v21  ;;  %v3123_v1 = vld [vmem:[%s4976_s7 + $0x78] sm:$0xff]  }
 0x1c5   : > { %5107 = vst [vmem:[#allocation48_spill] sm:$0xff] %v4100_v8  ;;  %v4109_v10 = vadd.f32 %v1234_v47, %v3760_v62  ;;  %v1307_v52 = vadd.f32 %v3976_v0, %v4100_v8  ;;  %v1373_v11 = vmul.f32 %v4100_v8, %v4100_v8  ;;  %v4116_v44 = vadd.f32 %v1165_v15, %v3752_v45  ;;  %v3125_v21 = vld [vmem:[%s4976_s7 + $0xf8] sm:$0xff]  }
 0x1c6   : > { %v1367_v47 = vmul.f32 %v4093_v60, %v4093_v60  ;;  %1293 = vadd.xlane.f32.xlu1 %v1292_v40  ;;  %v1419_v36 = vadd.f32 %v1418_v16, %v1352_v17  ;;  %v1426_v0 = vadd.f32 %v1425_v12, %v1358_v27  ;;  %v1300_v3 = vadd.f32 %v1299_v9, %v4093_v60  ;;  %v3124_v45 = vld [vmem:[%s4976_s7 + $0x38] sm:$0xff]   ;;  %v1238_v27 = vpop.f32.mrf.mxu1 }
 0x1c7   : > { %5108 = vst [vmem:[#allocation49_spill] sm:$0xff] %v4109_v10  ;;  %5109 = vst [vmem:[#allocation50_spill] sm:$0xff] %v4116_v44  ;;  %v3126_v2 = vld [vmem:[%s4976_s7 + $0xb8] sm:$0xff]   ;;  %v1443_v15 = vadd.f32 %v3981_v63, %v1373_v11  ;;  %v4135_v8 = vadd.f32 %v1236_v55, %v3736_v53  ;;  %v1308_v59 = vadd.f32 %v1307_v52, %v4116_v44  ;;  %2953 = vmatprep.subr.bf16.mxu0 %v3123_v1  ;;  %v3127_v53 = vld [vmem:[%s4976_s7 + $0x70] sm:$0xff]  }
 0x1c8   : > { %v1374_v12 = vmul.f32 %v4116_v44, %v4116_v44  ;;  %1420 = vadd.xlane.f32.xlu0 %v1419_v36  ;;  %v1360_v9 = vmul.f32 %v4080_v6, %v4080_v6  ;;  %v1427_v17 = vadd.f32 %v1426_v0, %v1359_v33  ;;  %v1301_v40 = vadd.f32 %v1300_v3, %v4109_v10  ;;  %v3129_v55 = vld [vmem:[%s4976_s7 + $0xf0] sm:$0xff]   ;;  %v3133_v36 = vld [vmem:[%s4976_s7 + $0xe8] sm:$0xff]   ;;  %v5136_v44 = vld [vmem:[#allocation13_spill] sm:$0xff] }
 0x1c9   : > { %5110 = vst [vmem:[#allocation51_spill] sm:$0xff] %v4135_v8  ;;  %v1435_v16 = vadd.f32 %v1434_v50, %v1366_v56  ;;  %v1309_v63 = vadd.f32 %v1308_v59, %v4135_v8  ;;  %2954 = vmatpush3.bf16.msra.mxu0 %v3124_v45  ;;  %2993 = vmatprep.subr.bf16.mxu1 %v3125_v21  ;;  %v3128_v59 = vld [vmem:[%s4976_s7 + $0x30] sm:$0xff]   ;;  %v3132_v45 = vld [vmem:[%s4976_s7 + $0x28] sm:$0xff]  }
 0x1ca   : > { %v4151_v52 = vadd.f32 %v1238_v27, %v3760_v62  ;;  %v1428_v11 = vadd.f32 %v1427_v17, %v1360_v9  ;;  %v1444_v1 = vadd.f32 %v1443_v15, %v1374_v12  ;;  %2994 = vmatpush3.bf16.msra.mxu1 %v3126_v2  ;;  %v3130_v50 = vld [vmem:[%s4976_s7 + $0xb0] sm:$0xff]   ;;  %2955 = vmatprep.subr.bf16.mxu0 %v3127_v53  ;;  %v3134_v2 = vld [vmem:[%s4976_s7 + $0xa8] sm:$0xff]   ;;  %v3135_v12 = vld [vmem:[%s4976_s7 + $0x60] sm:$0xff]  }
 0x1cb   : > { %v1436_v33 = vadd.f32 %v1435_v16, %v1367_v47  ;;  %2995 = vmatprep.subr.bf16.mxu1 %v3129_v55  ;;  %v1375_v56 = vmul.f32 %v4135_v8, %v4135_v8  ;;  %v1368_v21 = vmul.f32 %v4109_v10, %v4109_v10  ;;  %v3131_v47 = vld [vmem:[%s4976_s7 + $0x68] sm:$0xff]   ;;  %v3137_v27 = vld [vmem:[%s4976_s7 + $0xe0] sm:$0xff]   ;;  %v3139_v16 = vld [vmem:[%s4976_s7 + $0x58] sm:$0xff]  }
 0x1cc   : > { %5111 = vst [vmem:[#allocation52_spill] sm:$0xff] %v4151_v52  ;;  %1429 = vadd.xlane.f32.xlu1 %v1428_v11  ;;  %1302 = vadd.xlane.f32.xlu0 %v1301_v40  ;;  %v1310_v62 = vadd.f32 %v1309_v63, %v4151_v52  ;;  %v1376_v15 = vmul.f32 %v4151_v52, %v4151_v52  ;;  %v3136_v17 = vld [vmem:[%s4976_s7 + $0x20] sm:$0xff]   ;;  %v3141_v63 = vld [vmem:[%s4976_s7 + $0xd8] sm:$0xff]   ;;  %v3143_v11 = vld [vmem:[%s4976_s7 + $0x50] sm:$0xff]  }
 0x1cd   : > { %2956 = vmatpush3.bf16.msra.mxu0 %v3128_v59  ;;  %v1437_v0 = vadd.f32 %v1436_v33, %v1368_v21  ;;  %v1445_v3 = vadd.f32 %v1444_v1, %v1375_v56  ;;  %v3138_v40 = vld [vmem:[%s4976_s7 + $0xa0] sm:$0xff]   ;;  %v3140_v53 = vld [vmem:[%s4976_s7 + $0x18] sm:$0xff]   ;;  %v3145_v33 = vld [vmem:[%s4976_s7 + $0xd0] sm:$0xff]  }
 0x1ce   : > { %2996 = vmatpush3.bf16.msra.mxu1 %v3130_v50  ;;  %2957 = vmatprep.subr.bf16.mxu0 %v3131_v47  ;;  %v3142_v55 = vld [vmem:[%s4976_s7 + $0x98] sm:$0xff]   ;;  %v3144_v1 = vld [vmem:[%s4976_s7 + $0x10] sm:$0xff]   ;;  %v3147_v50 = vld [vmem:[%s4976_s7 + $0x48] sm:$0xff]  }
 0x1cf   : > { %2997 = vmatprep.subr.bf16.mxu1 %v3133_v36  ;;  %v1446_v9 = vadd.f32 %v1445_v3, %v1376_v15  ;;  %v3146_v59 = vld [vmem:[%s4976_s7 + $0x90] sm:$0xff]   ;;  %v3149_v56 = vld [vmem:[%s4976_s7 + $0xc8] sm:$0xff]   ;;  %v3151_v47 = vld [vmem:[%s4976_s7 + $0x40] sm:$0xff]  }
 0x1d0   : > { %1311 = vadd.xlane.f32.xlu1 %v1310_v62  ;;  %1438 = vadd.xlane.f32.xlu0 %v1437_v0  ;;  %v3148_v62 = vld [vmem:[%s4976_s7 + $0x8] sm:$0xff]   ;;  %v3153_v36 = vld [vmem:[%s4976_s7 + $0xc0] sm:$0xff]  }
 0x1d1   : > { %2958 = vmatpush3.bf16.msra.mxu0 %v3132_v45  ;;  %v3150_v21 = vld [vmem:[%s4976_s7 + $0x88] sm:$0xff]   ;;  %v3152_v0 = vld [vmem:[%s4976_s7] sm:$0xff]   ;;  %v3155_v45 = vld [vmem:[%s4976_s7 + $0x178] sm:$0xff]  }
 0x1d2   : > { %2998 = vmatpush3.bf16.msra.mxu1 %v3134_v2  ;;  %2959 = vmatprep.subr.bf16.mxu0 %v3135_v12  ;;  %v3154_v3 = vld [vmem:[%s4976_s7 + $0x80] sm:$0xff]   ;;  %v3157_v2 = vld [vmem:[%s4976_s7 + $0x1f8] sm:$0xff]  }
 0x1d3   : > { %2999 = vmatprep.subr.bf16.mxu1 %v3137_v27  ;;  %v1633_v15 = vld [vmem:[%s4974_s5] sm:$0xff] }
 0x1d4   : > { %1447 = vadd.xlane.f32.xlu1 %v1446_v9  ;;  %v1739_v12 = vld [vmem:[%s4975_s6] sm:$0xff] }
 0x1d5   : > { %2960 = vmatpush3.bf16.msra.mxu0 %v3136_v17  ;;  %v4253_v17 = vrot.slane %v1633_v15, %v3669_v41 }
 0x1d6   : > { %3000 = vmatpush3.bf16.msra.mxu1 %v3138_v40  ;;  %2961 = vmatprep.subr.bf16.mxu0 %v3139_v16  ;;  %v4256_v40 = vrot.slane %v1739_v12, %v3669_v41  ;;  %v4259_v16 = vrot.slane %v1633_v15, %v3680_v48 }
 0x1d7   : > { %3001 = vmatprep.subr.bf16.mxu1 %v3141_v63  ;;  %v4262_v63 = vrot.slane %v1739_v12, %v3680_v48 }
 0x1d9   : > { %2962 = vmatpush3.bf16.msra.mxu0 %v3140_v53  ;;  %v4265_v53 = vrot.slane %v1633_v15, %v3695_v29 }
 0x1da   : > { %3002 = vmatpush3.bf16.msra.mxu1 %v3142_v55  ;;  %2963 = vmatprep.subr.bf16.mxu0 %v3143_v11  ;;  %v4268_v55 = vrot.slane %v1739_v12, %v3695_v29  ;;  %v4271_v11 = vrot.slane %v1633_v15, %v3703_v32  ;;  %v4284_v29 = vrot.slane %v1633_v15, %v3691_v22 }
 0x1db   : > { %3003 = vmatprep.subr.bf16.mxu1 %v3145_v33  ;;  %5112 = vst [vmem:[#allocation53_spill] sm:$0xff] %v4265_v53  ;;  %v4274_v33 = vrot.slane %v1739_v12, %v3703_v32  ;;  %v4290_v32 = vrot.slane %v1739_v12, %v3691_v22  ;;  %v5137_v53 = vld [vmem:[#allocation18_spill] sm:$0xff] }
 0x1dc   : > { %5113 = vst [vmem:[#allocation54_spill] sm:$0xff] %v4268_v55  ;;  %5114 = vst [vmem:[#allocation55_spill] sm:$0xff] %v4271_v11  ;;  %v5125_v11 = vld [vmem:[#allocation9_spill] sm:$0xff] }
 0x1dd   : > { %2964 = vmatpush3.bf16.msra.mxu0 %v3144_v1  ;;  %5115 = vst [vmem:[#allocation56_spill] sm:$0xff] %v4274_v33 }
 0x1de   : > { %3004 = vmatpush3.bf16.msra.mxu1 %v3146_v59  ;;  %2965 = vmatprep.subr.bf16.mxu0 %v3147_v50  ;;  %v4277_v59 = vrot.slane %v1633_v15, %v3667_v34 }
 0x1df   : > { %3005 = vmatprep.subr.bf16.mxu1 %v3149_v56 }
 0x1e1   : > { %2966 = vmatpush3.bf16.msra.mxu0 %v3148_v62  ;;  %v4287_v62 = vrot.slane %v1739_v12, %v3667_v34 }
 0x1e2   : > { %3006 = vmatpush3.bf16.msra.mxu1 %v3150_v21  ;;  %2967 = vmatprep.subr.bf16.mxu0 %v3151_v47  ;;  %v4293_v21 = vrot.slane %v1633_v15, %v3717_v42  ;;  %v4296_v47 = vrot.slane %v1739_v12, %v3717_v42 }
 0x1e3   : > { %3007 = vmatprep.subr.bf16.mxu1 %v3153_v36 }
 0x1e4   : > { %5116 = vst [vmem:[#allocation57_spill] sm:$0xff] %v4296_v47 }
 0x1e5   : > { %2968 = vmatpush3.bf16.msra.mxu0 %v3152_v0 }
 0x1e6   : > { %3008 = vmatpush3.bf16.msra.mxu1 %v3154_v3  ;;  %3033 = vmatprep.subr.bf16.mxu0 %v3155_v45  ;;  %v4301_v3 = vrot.slane %v1633_v15, %v3725_v7  ;;  %v4304_v45 = vrot.slane %v1739_v12, %v3725_v7 }
 0x1e7   : > { %3073 = vmatprep.subr.bf16.mxu1 %v3157_v2 }
 0x1e8   : > { %5117 = vst [vmem:[#allocation58_spill] sm:$0xff] %v4301_v3  ;;  %5118 = vst [vmem:[#allocation59_spill] sm:$0xff] %v4304_v45 }
 0x23a   : > { %v1249_v27 = vpop.xlane.xlu0 %1248 }
 0x23b   : > { %v4250_v9 = vmul.f32 0.0009765625, %v1249_v27 }
 0x23d   : > { %v1465_v48 = vmul.f32 %v4250_v9, %v4250_v9  ;;  %v5141_v55 = vsub.f32 %v3741_v57, %v4250_v9 }
 0x23e   : > { %v1258_v41 = vpop.xlane.xlu1 %1257  ;;  %v1385_v1 = vpop.xlane.xlu0 %1384 }
 0x23f   : > { %v4279_v50 = vmul.f32 0.0009765625, %v1258_v41  ;;  %v1457_v56 = vmul.f32 0.0009765625, %v1385_v1 }
 0x241   : > { %v1473_v36 = vsub.f32 %v1457_v56, %v1465_v48  ;;  %v1466_v15 = vmul.f32 %v4279_v50, %v4279_v50  ;;  %v5140_v56 = vsub.f32 %v3683_v18, %v4250_v9  ;;  %v5144_v18 = vsub.f32 %v3928_v23, %v4250_v9 }
 0x242   : > { %v1394_v34 = vpop.xlane.xlu1 %1393  ;;  %v1267_v2 = vpop.xlane.xlu0 %1266 }
 0x243   : > { %v1481_v1 = vmax.f32 %v1473_v36, 0.0  ;;  %v1458_v7 = vmul.f32 0.0009765625, %v1394_v34  ;;  %v4316_v12 = vmul.f32 0.0009765625, %v1267_v2 }
 0x245   : > { %v1553_v41 = vadd.f32 1e-05, %v1481_v1  ;;  %v1474_v36 = vsub.f32 %v1458_v7, %v1466_v15  ;;  %v1467_v48 = vmul.f32 %v4316_v12, %v4316_v12 }
 0x246   : > { %v1276_v2 = vpop.xlane.xlu1 %1275  ;;  %v1403_v0 = vpop.xlane.xlu0 %1402 }
 0x247   : > { %3203 = vrsqrt.f32 %v1553_v41  ;;  %v1482_v15 = vmax.f32 %v1474_v36, 0.0  ;;  %v4338_v7 = vmul.f32 0.0009765625, %v1276_v2  ;;  %v1459_v42 = vmul.f32 0.0009765625, %v1403_v0  ;;  %v5120_v41 = vld [vmem:[#allocation2_spill] sm:$0xff]  ;;  %v5121_v2 = vld [vmem:[#allocation4_spill] sm:$0xff]  ;;  %v5124_v0 = vld [vmem:[#allocation5_spill] sm:$0xff] }
 0x249   : > { %v1554_v60 = vadd.f32 1e-05, %v1482_v15  ;;  %v1475_v52 = vsub.f32 %v1459_v42, %v1467_v48  ;;  %v1468_v1 = vmul.f32 %v4338_v7, %v4338_v7 }
 0x24b   : > { %v1412_v34 = vpop.xlane.xlu1 %1411  ;;  %v1285_v10 = vpop.xlane.xlu0 %1284  ;;  %3205 = vrsqrt.f32 %v1554_v60  ;;  %v1483_v48 = vmax.f32 %v1475_v52, 0.0  ;;  %v5127_v60 = vld [vmem:[#allocation6_spill] sm:$0xff]  ;;  %v5131_v52 = vld [vmem:[#allocation8_spill] sm:$0xff] }
 0x24c   : > { %v1460_v27 = vmul.f32 0.0009765625, %v1412_v34  ;;  %v4360_v36 = vmul.f32 0.0009765625, %v1285_v10  ;;  %v5132_v10 = vld [vmem:[#allocation12_spill] sm:$0xff] }
 0x24d   : > { %v1555_v58 = vadd.f32 1e-05, %v1483_v48 }
 0x24e   : > { %v1476_v22 = vsub.f32 %v1460_v27, %v1468_v1  ;;  %v1469_v33 = vmul.f32 %v4360_v36, %v4360_v36 }
 0x24f   : > { %v1294_v42 = vpop.xlane.xlu1 %1293  ;;  %3207 = vrsqrt.f32 %v1555_v58 }
 0x250   : > { %v1484_v27 = vmax.f32 %v1476_v22, 0.0  ;;  %v4382_v1 = vmul.f32 0.0009765625, %v1294_v42 }
 0x251   : > { %v1421_v38 = vpop.xlane.xlu0 %1420 }
 0x252   : > { %v1556_v58 = vadd.f32 1e-05, %v1484_v27  ;;  %v1461_v22 = vmul.f32 0.0009765625, %v1421_v38  ;;  %v1470_v45 = vmul.f32 %v4382_v1, %v4382_v1  ;;  %v5138_v27 = vld [vmem:[#allocation11_spill] sm:$0xff] }
 0x254   : > { %3209 = vrsqrt.f32 %v1556_v58  ;;  %v1477_v38 = vsub.f32 %v1461_v22, %v1469_v33  ;;  %v4410_v34 = vpop.eup %3203  ;;  %v5142_v58 = vsub.f32 %v3686_v20, %v4250_v9 }
 0x255   : > { %v1430_v13 = vpop.xlane.xlu1 %1429  ;;  %v1303_v8 = vpop.xlane.xlu0 %1302  ;;  %v1570_v31 = vmul.f32 %v4410_v34, %v5140_v56  ;;  %v1572_v15 = vmul.f32 %v4410_v34, %v5141_v55  ;;  %v4442_v56 = vmul.f32 %v4410_v34, %v5144_v18  ;;  %v5145_v18 = vld [vmem:[#allocation17_spill] sm:$0xff] }
 0x256   : > { %v1485_v22 = vmax.f32 %v1477_v38, 0.0  ;;  %v1462_v48 = vmul.f32 0.0009765625, %v1430_v13  ;;  %v4420_v42 = vmul.f32 0.0009765625, %v1303_v8  ;;  %v1569_v14 = vmul.f32 %v4410_v34, %v5142_v58 }
 0x257   : > { %v5143_v13 = vsub.f32 %v3708_v35, %v4250_v9  ;;  %v1676_v20 = vmul.f32 %v4277_v59, %v1570_v31  ;;  %v1678_v35 = vmul.f32 %v4284_v29, %v1572_v15  ;;  %v5146_v31 = vsub.f32 %v3701_v5, %v4279_v50 }
 0x258   : > { %v1557_v38 = vadd.f32 1e-05, %v1485_v22  ;;  %v1478_v57 = vsub.f32 %v1462_v48, %v1470_v45  ;;  %v1471_v55 = vmul.f32 %v4420_v42, %v4420_v42  ;;  %v4447_v33 = vpop.eup %3205 }
 0x259   : > { %v1571_v8 = vmul.f32 %v4410_v34, %v5143_v13  ;;  %v1312_v58 = vpop.xlane.xlu1 %1311  ;;  %v1439_v4 = vpop.xlane.xlu0 %1438  ;;  %v1675_v13 = vmul.f32 %v4253_v17, %v1569_v14  ;;  %v1578_v51 = vmul.f32 %v4447_v33, %v5146_v31  ;;  %v1782_v3 = vadd.f32 %v4287_v62, %v1676_v20 }
 0x25a   : > { %3211 = vrsqrt.f32 %v1557_v38  ;;  %v1486_v45 = vmax.f32 %v1478_v57, 0.0  ;;  %v4454_v48 = vmul.f32 0.0009765625, %v1312_v58  ;;  %v1463_v22 = vmul.f32 0.0009765625, %v1439_v4 }
 0x25b   : > { %v1677_v23 = vmul.f32 %v4259_v16, %v1571_v8  ;;  %v5147_v14 = vsub.f32 %v3747_v43, %v4279_v50  ;;  %v1784_v8 = vadd.f32 %v4290_v32, %v1678_v35  ;;  %v5148_v4 = vsub.f32 %v3698_v30, %v4279_v50 }
 0x25c   : > { %v1558_v6 = vadd.f32 1e-05, %v1486_v45  ;;  %v1479_v38 = vsub.f32 %v1463_v22, %v1471_v55  ;;  %v1472_v57 = vmul.f32 %v4454_v48, %v4454_v48  ;;  %v4472_v58 = vpop.eup %3207  ;;  %v1684_v31 = vmul.f32 %v4277_v59, %v1578_v51 }
 0x25d   : > { %v1580_v15 = vmul.f32 %v4447_v33, %v5147_v14  ;;  %v1577_v5 = vmul.f32 %v4447_v33, %v5148_v4  ;;  %v1448_v20 = vpop.xlane.xlu1 %1447  ;;  %v1781_v14 = vadd.f32 %v4256_v40, %v1675_v13  ;;  %v5149_v55 = vsub.f32 %v3720_v46, %v4279_v50 }
 0x25e   : > { %3213 = vrsqrt.f32 %v1558_v6  ;;  %v1487_v45 = vmax.f32 %v1479_v38, 0.0  ;;  %v1464_v22 = vmul.f32 0.0009765625, %v1448_v20  ;;  %v1790_v4 = vadd.f32 %v4287_v62, %v1684_v31 }
 0x25f   : > { %v1686_v43 = vmul.f32 %v4284_v29, %v1580_v15  ;;  %v1579_v35 = vmul.f32 %v4447_v33, %v5149_v55  ;;  %v1683_v30 = vmul.f32 %v4253_v17, %v1577_v5  ;;  %v1783_v15 = vadd.f32 %v4262_v63, %v1677_v23 }
 0x260   : > { %v1559_v37 = vadd.f32 1e-05, %v1487_v45  ;;  %v1480_v13 = vsub.f32 %v1464_v22, %v1472_v57  ;;  %v5150_v46 = vsub.f32 %v3733_v19, %v4316_v12  ;;  %v1846_v5 = vpack.c.bf16 %v1790_v4, %v1782_v3 }
 0x261   : > { %v1792_v47 = vadd.f32 %v4290_v32, %v1686_v43  ;;  %v1685_v51 = vmul.f32 %v4259_v16, %v1579_v35  ;;  %v1789_v49 = vadd.f32 %v4256_v40, %v1683_v30  ;;  %v4491_v38 = vpop.eup %3209  ;;  %v3156_v43 = vld [vmem:[%s4976_s7 + $0x138] sm:$0xff]   ;;  %v5151_v23 = vsub.f32 %v3779_v39, %v4316_v12 }
 0x262   : > { %v1586_v6 = vmul.f32 %v4472_v58, %v5150_v46  ;;  %3215 = vrsqrt.f32 %v1559_v37  ;;  %v1488_v55 = vmax.f32 %v1480_v13, 0.0  ;;  %v3158_v35 = vld [vmem:[%s4976_s7 + $0x1b8] sm:$0xff]   ;;  %v5152_v3 = vsub.f32 %v5124_v0, %v4338_v7  ;;  %2428 = vmatprep.mubr.bf16.mxu0 %v1846_v5  ;;  %v3161_v37 = vld [vmem:[%s4976_s7 + $0x1f0] sm:$0xff]  }
 0x263   : > { %v1848_v20 = vpack.c.bf16 %v1792_v47, %v1784_v8  ;;  %v1791_v31 = vadd.f32 %v4262_v63, %v1685_v51  ;;  %v1588_v57 = vmul.f32 %v4472_v58, %v5151_v23  ;;  %v1845_v19 = vpack.c.bf16 %v1789_v49, %v1781_v14  ;;  %v3159_v47 = vld [vmem:[%s4976_s7 + $0x170] sm:$0xff]   ;;  %v3163_v23 = vld [vmem:[%s4976_s7 + $0x168] sm:$0xff]  }
 0x264   : > { %v1594_v8 = vmul.f32 %v4491_v38, %v5152_v3  ;;  %v1692_v49 = vmul.f32 %v4277_v59, %v1586_v6  ;;  %v5153_v14 = vsub.f32 %v5125_v11, %v4338_v7  ;;  %v1560_v22 = vadd.f32 1e-05, %v1488_v55 }
 0x265   : > { %2493 = vmatprep.mubr.bf16.mxu1 %v1848_v20  ;;  %v1847_v39 = vpack.c.bf16 %v1791_v31, %v1783_v15  ;;  %2429 = vmatmul.mubr.bf16.vlgmr.msra.gmra.mxu0 %v1845_v19  ;;  %v1694_v30 = vmul.f32 %v4284_v29, %v1588_v57  ;;  %v5154_v4 = vsub.f32 %v5120_v41, %v4316_v12  ;;  %v3160_v15 = vld [vmem:[%s4976_s7 + $0x130] sm:$0xff]  }
 0x266   : > { %v1596_v45 = vmul.f32 %v4491_v38, %v5153_v14  ;;  %v1700_v0 = vmul.f32 %v4277_v59, %v1594_v8  ;;  %3034 = vmatpush3.bf16.msra.mxu0 %v3156_v43  ;;  %v1798_v11 = vadd.f32 %v4287_v62, %v1692_v49  ;;  %v5155_v46 = vsub.f32 %v5126_v25, %v4338_v7  ;;  %v3162_v41 = vld [vmem:[%s4976_s7 + $0x1b0] sm:$0xff]  }
 0x267   : > { %v1585_v51 = vmul.f32 %v4472_v58, %v5154_v4  ;;  %2494 = vmatmul.mubr.bf16.vlgmr.msra.gmra.mxu1 %v1847_v39  ;;  %3217 = vrsqrt.f32 %v1560_v22  ;;  %3035 = vmatprep.subr.bf16.mxu0 %v3159_v47  ;;  %v1800_v20 = vadd.f32 %v4290_v32, %v1694_v30  ;;  %v4540_v43 = vpop.eup %3211  ;;  %v5156_v55 = vsub.f32 %v5121_v2, %v4316_v12  ;;  %v3165_v39 = vld [vmem:[%s4976_s7 + $0x1e8] sm:$0xff]  }
 0x268   : > { %v1702_v13 = vmul.f32 %v4284_v29, %v1596_v45  ;;  %v1593_v6 = vmul.f32 %v4491_v38, %v5155_v46  ;;  %3074 = vmatpush3.bf16.msra.mxu1 %v3158_v35  ;;  %v1806_v5 = vadd.f32 %v4287_v62, %v1700_v0  ;;  %v5157_v35 = vsub.f32 %v5127_v60, %v4338_v7 }
 0x269   : > { %v1691_v31 = vmul.f32 %v4253_v17, %v1585_v51  ;;  %3075 = vmatprep.subr.bf16.mxu1 %v3161_v37  ;;  %v1587_v19 = vmul.f32 %v4472_v58, %v5156_v55  ;;  %v5158_v37 = vsub.f32 %v5131_v52, %v4360_v36  ;;  %v5159_v2 = vsub.f32 %v5132_v10, %v4360_v36  ;;  %v3164_v52 = vld [vmem:[%s4976_s7 + $0x128] sm:$0xff]  }
 0x26a   : > { %v1808_v25 = vadd.f32 %v4290_v32, %v1702_v13  ;;  %v1699_v57 = vmul.f32 %v4253_v17, %v1593_v6  ;;  %v1595_v47 = vmul.f32 %v4491_v38, %v5157_v35  ;;  %v1854_v3 = vpack.c.bf16 %v1806_v5, %v1798_v11  ;;  %3036 = vmatpush3.bf16.msra.mxu0 %v3160_v15  ;;  %v3166_v10 = vld [vmem:[%s4976_s7 + $0x1a8] sm:$0xff]  }
 0x26b   : > { %v1797_v8 = vadd.f32 %v4256_v40, %v1691_v31  ;;  %v1602_v49 = vmul.f32 %v4540_v43, %v5158_v37  ;;  %v1604_v14 = vmul.f32 %v4540_v43, %v5159_v2  ;;  %v1693_v22 = vmul.f32 %v4259_v16, %v1587_v19  ;;  %v4582_v11 = vpop.eup %3213  ;;  %3037 = vmatprep.subr.bf16.mxu0 %v3163_v23  ;;  %v3171_v2 = vld [vmem:[%s4976_s7 + $0x158] sm:$0xff]  }
 0x26c   : > { %v1856_v60 = vpack.c.bf16 %v1808_v25, %v1800_v20  ;;  %v1805_v45 = vadd.f32 %v4256_v40, %v1699_v57  ;;  %v1701_v0 = vmul.f32 %v4259_v16, %v1595_v47  ;;  %3076 = vmatpush3.bf16.msra.mxu1 %v3162_v41  ;;  %2436 = vmatprep.mubr.bf16.mxu0 %v1854_v3  ;;  %v3167_v41 = vld [vmem:[%s4976_s7 + $0x160] sm:$0xff]  }
 0x26d   : > { %v1708_v30 = vmul.f32 %v4277_v59, %v1602_v49  ;;  %v1710_v4 = vmul.f32 %v4284_v29, %v1604_v14  ;;  %v5160_v51 = vsub.f32 %v5133_v28, %v4360_v36  ;;  %v1799_v46 = vadd.f32 %v4262_v63, %v1693_v22  ;;  %3077 = vmatprep.subr.bf16.mxu1 %v3165_v39  ;;  %v3169_v28 = vld [vmem:[%s4976_s7 + $0x1e0] sm:$0xff]  }
 0x26e   : > { %2501 = vmatprep.mubr.bf16.mxu1 %v1856_v60  ;;  %v1853_v13 = vpack.c.bf16 %v1805_v45, %v1797_v8  ;;  %v1807_v6 = vadd.f32 %v4262_v63, %v1701_v0  ;;  %v5161_v5 = vsub.f32 %v5136_v44, %v4382_v1  ;;  %v5162_v25 = vsub.f32 %v5137_v53, %v4382_v1  ;;  %v3168_v53 = vld [vmem:[%s4976_s7 + $0x120] sm:$0xff]  }
 0x26f   : > { %v1601_v15 = vmul.f32 %v4540_v43, %v5160_v51  ;;  %v1814_v31 = vadd.f32 %v4287_v62, %v1708_v30  ;;  %v1816_v57 = vadd.f32 %v4290_v32, %v1710_v4  ;;  %v5163_v19 = vsub.f32 %v5138_v27, %v4382_v1  ;;  %3038 = vmatpush3.bf16.msra.mxu0 %v3164_v52  ;;  %v3170_v8 = vld [vmem:[%s4976_s7 + $0x1a0] sm:$0xff]   ;;  %v4623_v49 = vpop.eup %3215 }
 0x270   : > { %v1610_v20 = vmul.f32 %v4582_v11, %v5161_v5  ;;  %v1612_v23 = vmul.f32 %v4582_v11, %v5162_v25  ;;  %2437 = vmatmul.mubr.bf16.gmra.mxu0 %v1853_v13  ;;  %v1855_v55 = vpack.c.bf16 %v1807_v6, %v1799_v46  ;;  %v5164_v47 = vsub.f32 %v5134_v54, %v4360_v36  ;;  %v5168_v46 = vld [vmem:[#allocation19_spill] sm:$0xff]  ;;  %v3174_v25 = vld [vmem:[%s4976_s7 + $0x198] sm:$0xff]  }
 0x271   : > { %v1609_v35 = vmul.f32 %v4582_v11, %v5163_v19  ;;  %v1707_v44 = vmul.f32 %v4253_v17, %v1601_v15  ;;  %3078 = vmatpush3.bf16.msra.mxu1 %v3166_v10  ;;  %v5165_v37 = vsub.f32 %v5139_v26, %v4382_v1  ;;  %3039 = vmatprep.subr.bf16.mxu0 %v3167_v41  ;;  %v3173_v26 = vld [vmem:[%s4976_s7 + $0x1d8] sm:$0xff]   ;;  %v5166_v10 = vld [vmem:[#allocation22_spill] sm:$0xff] }
 0x272   : > { %v1603_v3 = vmul.f32 %v4540_v43, %v5164_v47  ;;  %v1716_v27 = vmul.f32 %v4277_v59, %v1610_v20  ;;  %v1718_v39 = vmul.f32 %v4284_v29, %v1612_v23  ;;  %2502 = vmatmul.mubr.bf16.gmra.mxu1 %v1855_v55  ;;  %3079 = vmatprep.subr.bf16.mxu1 %v3169_v28  ;;  %v3172_v20 = vld [vmem:[%s4976_s7 + $0x118] sm:$0xff]   ;;  %v5169_v55 = vld [vmem:[#allocation23_spill] sm:$0xff] }
 0x273   : > { %v1611_v54 = vmul.f32 %v4582_v11, %v5165_v37  ;;  %v1715_v14 = vmul.f32 %v4253_v17, %v1609_v35  ;;  %v1813_v60 = vadd.f32 %v4256_v40, %v1707_v44  ;;  %v1546_v30 = vsub.f32 %v5166_v10, %v4454_v48  ;;  %3040 = vmatpush3.bf16.msra.mxu0 %v3168_v53  ;;  %v3177_v44 = vld [vmem:[%s4976_s7 + $0x1d0] sm:$0xff]  }
 0x274   : > { %v1709_v45 = vmul.f32 %v4259_v16, %v1603_v3  ;;  %v1822_v22 = vadd.f32 %v4287_v62, %v1716_v27  ;;  %v1824_v0 = vadd.f32 %v4290_v32, %v1718_v39  ;;  %v5167_v15 = vsub.f32 %v5145_v18, %v4420_v42  ;;  %v4654_v18 = vpop.eup %3217  ;;  %3041 = vmatprep.subr.bf16.mxu0 %v3171_v2  ;;  %v5170_v27 = vld [vmem:[#allocation15_spill] sm:$0xff]  ;;  %v5171_v37 = vld [vmem:[#allocation20_spill] sm:$0xff] }
 0x275   : > { %v1717_v52 = vmul.f32 %v4259_v16, %v1611_v54  ;;  %v1821_v4 = vadd.f32 %v4256_v40, %v1715_v14  ;;  %v1540_v6 = vsub.f32 %v5168_v46, %v4420_v42  ;;  %3080 = vmatpush3.bf16.msra.mxu1 %v3170_v8  ;;  %v1548_v19 = vsub.f32 %v5169_v55, %v4454_v48  ;;  %v3176_v2 = vld [vmem:[%s4976_s7 + $0x110] sm:$0xff]  }
 0x276   : > { %v1815_v51 = vadd.f32 %v4262_v63, %v1709_v45  ;;  %v1618_v13 = vmul.f32 %v4623_v49, %v5167_v15  ;;  %v1862_v41 = vpack.c.bf16 %v1822_v22, %v1814_v31  ;;  %v1864_v28 = vpack.c.bf16 %v1824_v0, %v1816_v57  ;;  %3081 = vmatprep.subr.bf16.mxu1 %v3173_v26  ;;  %v3175_v31 = vld [vmem:[%s4976_s7 + $0x150] sm:$0xff]   ;;  %v5173_v15 = vld [vmem:[#allocation21_spill] sm:$0xff] }
 0x277   : > { %v1823_v5 = vadd.f32 %v4262_v63, %v1717_v52  ;;  %v1861_v23 = vpack.c.bf16 %v1821_v4, %v1813_v60  ;;  %v1626_v47 = vmul.f32 %v4654_v18, %v1546_v30  ;;  %v1620_v3 = vmul.f32 %v4623_v49, %v1540_v6  ;;  %3042 = vmatpush3.bf16.msra.mxu0 %v3172_v20  ;;  %v3178_v14 = vld [vmem:[%s4976_s7 + $0x190] sm:$0xff]   ;;  %v3179_v52 = vld [vmem:[%s4976_s7 + $0x148] sm:$0xff]  }
 0x278   : > { %v1724_v57 = vmul.f32 %v4277_v59, %v1618_v13  ;;  %2444 = vmatprep.mubr.bf16.mxu0 %v1862_v41  ;;  %2509 = vmatprep.mubr.bf16.mxu1 %v1864_v28  ;;  %v1628_v8 = vmul.f32 %v4654_v18, %v1548_v19  ;;  %v1537_v39 = vsub.f32 %v5170_v27, %v4420_v42  ;;  %v5172_v26 = vld [vmem:[#allocation16_spill] sm:$0xff] }
 0x279   : > { %v1863_v35 = vpack.c.bf16 %v1823_v5, %v1815_v51  ;;  %2445 = vmatmul.mubr.bf16.gmra.mxu0 %v1861_v23  ;;  %v1545_v54 = vsub.f32 %v5171_v37, %v4454_v48  ;;  %3082 = vmatpush3.bf16.msra.mxu1 %v3174_v25  ;;  %v1732_v60 = vmul.f32 %v4277_v59, %v1626_v47  ;;  %v3181_v59 = vld [vmem:[%s4976_s7 + $0x1c8] sm:$0xff]   ;;  %v3185_v47 = vld [vmem:[%s4976_s7 + $0x1c0] sm:$0xff]  }
 0x27a   : > { %v1830_v53 = vadd.f32 %v4287_v62, %v1724_v57  ;;  %v1726_v45 = vmul.f32 %v4284_v29, %v1620_v3  ;;  %v1539_v22 = vsub.f32 %v5172_v26, %v4420_v42  ;;  %3043 = vmatprep.subr.bf16.mxu0 %v3175_v31  ;;  %v1734_v0 = vmul.f32 %v4284_v29, %v1628_v8  ;;  %v3183_v57 = vld [vmem:[%s4976_s7 + $0x140] sm:$0xff]   ;;  %v5176_v8 = vld [vmem:[#allocation28_spill] sm:$0xff] }
 0x27b   : > { %2510 = vmatmul.mubr.bf16.gmra.mxu1 %v1863_v35  ;;  %v1617_v10 = vmul.f32 %v4623_v49, %v1537_v39  ;;  %v1625_v30 = vmul.f32 %v4654_v18, %v1545_v54  ;;  %3083 = vmatprep.subr.bf16.mxu1 %v3177_v44  ;;  %v1838_v4 = vadd.f32 %v4287_v62, %v1732_v60  ;;  %v5178_v39 = vld [vmem:[#allocation24_spill] sm:$0xff] }
 0x27c   : > { %v1832_v51 = vadd.f32 %v4290_v32, %v1726_v45  ;;  %v1547_v29 = vsub.f32 %v5173_v15, %v4454_v48  ;;  %v1619_v13 = vmul.f32 %v4623_v49, %v1539_v22  ;;  %v1840_v46 = vadd.f32 %v4290_v32, %v1734_v0  ;;  %3044 = vmatpush3.bf16.msra.mxu0 %v3176_v2  ;;  %v3180_v32 = vld [vmem:[%s4976_s7 + $0x108] sm:$0xff]   ;;  %v5180_v2 = vld [vmem:[#allocation57_spill] sm:$0xff]  ;;  %v3184_v22 = vld [vmem:[%s4976_s7 + $0x100] sm:$0xff]  }
 0x27d   : > { %v1723_v6 = vmul.f32 %v4253_v17, %v1617_v10  ;;  %v1731_v41 = vmul.f32 %v4253_v17, %v1625_v30  ;;  %v5174_v28 = vsub.f32 %v3959_v61, %v4279_v50  ;;  %3084 = vmatpush3.bf16.msra.mxu1 %v3178_v14  ;;  %v1870_v62 = vpack.c.bf16 %v1838_v4, %v1830_v53  ;;  %v3182_v17 = vld [vmem:[%s4976_s7 + $0x188] sm:$0xff]   ;;  %v5182_v0 = vld [vmem:[#allocation26_spill] sm:$0xff]  ;;  %v5184_v4 = vld [vmem:[#allocation53_spill] sm:$0xff] }
 0x27e   : > { %v1627_v20 = vmul.f32 %v4654_v18, %v1547_v29  ;;  %v1725_v25 = vmul.f32 %v4259_v16, %v1619_v13  ;;  %v1872_v23 = vpack.c.bf16 %v1840_v46, %v1832_v51  ;;  %3045 = vmatprep.subr.bf16.mxu0 %v3179_v52  ;;  %3085 = vmatprep.subr.bf16.mxu1 %v3181_v59  ;;  %v5185_v15 = vld [vmem:[#allocation25_spill] sm:$0xff]  ;;  %v5187_v46 = vld [vmem:[#allocation59_spill] sm:$0xff] }
 0x27f   : > { %v1582_v5 = vmul.f32 %v4447_v33, %v5174_v28  ;;  %v1829_v61 = vadd.f32 %v4256_v40, %v1723_v6  ;;  %v1837_v31 = vadd.f32 %v4256_v40, %v1731_v41  ;;  %2452 = vmatprep.mubr.bf16.mxu0 %v1870_v62  ;;  %v1680_v35 = vmul.f32 %v4293_v21, %v4442_v56 }
 0x280   : > { %v1733_v55 = vmul.f32 %v4259_v16, %v1627_v20  ;;  %v1831_v19 = vadd.f32 %v4262_v63, %v1725_v25  ;;  %2517 = vmatprep.mubr.bf16.mxu1 %v1872_v23  ;;  %v5175_v3 = vsub.f32 %v3952_v24, %v4250_v9  ;;  %v5177_v16 = vsub.f32 %v5176_v8, %v4279_v50  ;;  %v5181_v24 = vld [vmem:[#allocation58_spill] sm:$0xff] }
 0x281   : > { %v1688_v44 = vmul.f32 %v4293_v21, %v1582_v5  ;;  %v1869_v40 = vpack.c.bf16 %v1837_v31, %v1829_v61  ;;  %v5179_v56 = vsub.f32 %v5178_v39, %v4250_v9  ;;  %3046 = vmatpush3.bf16.msra.mxu0 %v3180_v32  ;;  %v1786_v14 = vadd.f32 %v5180_v2, %v1680_v35  ;;  %v5188_v5 = vld [vmem:[#allocation27_spill] sm:$0xff]  ;;  %v5190_v25 = vld [vmem:[#allocation54_spill] sm:$0xff] }
 0x282   : > { %v1576_v53 = vmul.f32 %v4410_v34, %v5175_v3  ;;  %v1584_v27 = vmul.f32 %v4447_v33, %v5177_v16  ;;  %v1839_v54 = vadd.f32 %v4262_v63, %v1733_v55  ;;  %3086 = vmatpush3.bf16.msra.mxu1 %v3182_v17  ;;  %3047 = vmatprep.subr.bf16.mxu0 %v3183_v57  ;;  %v3186_v63 = vld [vmem:[%s4976_s7 + $0x180] sm:$0xff]   ;;  %v5191_v17 = vld [vmem:[#allocation55_spill] sm:$0xff]  ;;  %v5194_v55 = vld [vmem:[#allocation56_spill] sm:$0xff] }
 0x283   : > { %v1573_v37 = vmul.f32 %v4410_v34, %v5179_v56  ;;  %v1794_v60 = vadd.f32 %v5180_v2, %v1688_v44  ;;  %2453 = vmatmul.mubr.bf16.gmra.mxu0 %v1869_v40  ;;  %v5183_v52 = vsub.f32 %v5182_v0, %v4279_v50  ;;  %3087 = vmatprep.subr.bf16.mxu1 %v3185_v47  ;;  %v5197_v40 = vld [vmem:[#allocation33_spill] sm:$0xff] }
 0x284   : > { %v1682_v45 = vmul.f32 %v5181_v24, %v1576_v53  ;;  %v1690_v26 = vmul.f32 %v5181_v24, %v1584_v27  ;;  %v1871_v30 = vpack.c.bf16 %v1839_v54, %v1831_v19  ;;  %v5186_v29 = vsub.f32 %v5185_v15, %v4250_v9  ;;  %v5192_v9 = vld [vmem:[#allocation30_spill] sm:$0xff]  ;;  %v5199_v27 = vld [vmem:[#allocation36_spill] sm:$0xff] }
 0x285   : > { %v1581_v10 = vmul.f32 %v4447_v33, %v5183_v52  ;;  %v1850_v59 = vpack.c.bf16 %v1794_v60, %v1786_v14  ;;  %v1679_v51 = vmul.f32 %v5184_v4, %v1573_v37  ;;  %v5189_v62 = vsub.f32 %v5188_v5, %v4279_v50  ;;  %3048 = vmatpush3.bf16.msra.mxu0 %v3184_v22  ;;  %v5195_v19 = vld [vmem:[#allocation34_spill] sm:$0xff]  ;;  %v5201_v37 = vld [vmem:[#allocation29_spill] sm:$0xff]  ;;  %v5203_v22 = vld [vmem:[#allocation32_spill] sm:$0xff] }
 0x286   : > { %v1575_v13 = vmul.f32 %v4410_v34, %v5186_v29  ;;  %v1788_v6 = vadd.f32 %v5187_v46, %v1682_v45  ;;  %v1796_v41 = vadd.f32 %v5187_v46, %v1690_v26  ;;  %2518 = vmatmul.mubr.bf16.gmra.mxu1 %v1871_v30  ;;  %v5193_v34 = vsub.f32 %v5192_v9, %v4316_v12 }
 0x287   : > { %v1687_v28 = vmul.f32 %v5184_v4, %v1581_v10  ;;  %v1583_v20 = vmul.f32 %v4447_v33, %v5189_v62  ;;  %2558 = vmatprep.mubr.bf16.mxu0 %v1850_v59  ;;  %v1785_v32 = vadd.f32 %v5190_v25, %v1679_v51  ;;  %3088 = vmatpush3.bf16.msra.mxu1 %v3186_v63  ;;  %v5205_v59 = vld [vmem:[#allocation31_spill] sm:$0xff] }
 0x288   : > { %v1681_v23 = vmul.f32 %v5191_v17, %v1575_v13  ;;  %v1590_v61 = vmul.f32 %v4472_v58, %v5193_v34  ;;  %v1852_v31 = vpack.c.bf16 %v1796_v41, %v1788_v6  ;;  %v5196_v35 = vsub.f32 %v5195_v19, %v4338_v7  ;;  %v5207_v41 = vld [vmem:[#allocation35_spill] sm:$0xff]  ;;  %v5213_v19 = vld [vmem:[#allocation41_spill] sm:$0xff] }
 0x289   : > { %v1793_v57 = vadd.f32 %v5190_v25, %v1687_v28  ;;  %v1689_v50 = vmul.f32 %v5191_v17, %v1583_v20  ;;  %v5198_v3 = vsub.f32 %v5197_v40, %v4316_v12  ;;  %v5200_v39 = vsub.f32 %v5199_v27, %v4338_v7 }
 0x28a   : > { %v1787_v33 = vadd.f32 %v5194_v55, %v1681_v23  ;;  %v1598_v44 = vmul.f32 %v4491_v38, %v5196_v35  ;;  %v1696_v47 = vmul.f32 %v4293_v21, %v1590_v61  ;;  %2623 = vmatprep.mubr.bf16.mxu1 %v1852_v31  ;;  %v5202_v54 = vsub.f32 %v5201_v37, %v4316_v12 }
 0x28b   : > { %v1592_v53 = vmul.f32 %v4472_v58, %v5198_v3  ;;  %v1849_v8 = vpack.c.bf16 %v1793_v57, %v1785_v32  ;;  %v1795_v16 = vadd.f32 %v5194_v55, %v1689_v50  ;;  %v1600_v56 = vmul.f32 %v4491_v38, %v5200_v39 }
 0x28c   : > { %v1589_v14 = vmul.f32 %v4472_v58, %v5202_v54  ;;  %v1704_v60 = vmul.f32 %v4293_v21, %v1598_v44  ;;  %v1802_v45 = vadd.f32 %v5180_v2, %v1696_v47  ;;  %v5204_v63 = vsub.f32 %v5203_v22, %v4338_v7 }
 0x28d   : > { %v1698_v26 = vmul.f32 %v5181_v24, %v1592_v53  ;;  %2559 = vmatmul.mubr.bf16.vlgmr.msra.gmra.mxu0 %v1849_v8  ;;  %v1851_v52 = vpack.c.bf16 %v1795_v16, %v1787_v33  ;;  %v1706_v10 = vmul.f32 %v5181_v24, %v1600_v56  ;;  %v5206_v51 = vsub.f32 %v5205_v59, %v4316_v12  ;;  %v5209_v12 = vld [vmem:[#allocation38_spill] sm:$0xff]  ;;  %v5215_v53 = vld [vmem:[#allocation45_spill] sm:$0xff] }
 0x28e   : > { %v1597_v0 = vmul.f32 %v4491_v38, %v5204_v63  ;;  %v1695_v30 = vmul.f32 %v5184_v4, %v1589_v14  ;;  %v1810_v29 = vadd.f32 %v5180_v2, %v1704_v60  ;;  %v5208_v28 = vsub.f32 %v5207_v41, %v4338_v7  ;;  %v5211_v7 = vld [vmem:[#allocation42_spill] sm:$0xff]  ;;  %v5217_v56 = vld [vmem:[#allocation37_spill] sm:$0xff]  ;;  %v5219_v14 = vld [vmem:[#allocation40_spill] sm:$0xff] }
 0x28f   : > { %v1591_v15 = vmul.f32 %v4472_v58, %v5206_v51  ;;  %v1804_v13 = vadd.f32 %v5187_v46, %v1698_v26  ;;  %v1812_v62 = vadd.f32 %v5187_v46, %v1706_v10  ;;  %v5210_v58 = vsub.f32 %v5209_v12, %v4360_v36  ;;  %2624 = vmatmul.mubr.bf16.vlgmr.msra.gmra.mxu1 %v1851_v52 }
 0x290   : > { %v1703_v6 = vmul.f32 %v5184_v4, %v1597_v0  ;;  %v1599_v5 = vmul.f32 %v4491_v38, %v5208_v28  ;;  %v1801_v20 = vadd.f32 %v5190_v25, %v1695_v30  ;;  %v1858_v9 = vpack.c.bf16 %v1810_v29, %v1802_v45  ;;  %v5221_v0 = vld [vmem:[#allocation39_spill] sm:$0xff] }
 0x291   : > { %v1697_v32 = vmul.f32 %v5191_v17, %v1591_v15  ;;  %v1606_v23 = vmul.f32 %v4540_v43, %v5210_v58  ;;  %v5212_v38 = vsub.f32 %v5211_v7, %v4382_v1  ;;  %v1860_v57 = vpack.c.bf16 %v1812_v62, %v1804_v13  ;;  %v5223_v15 = vld [vmem:[#allocation43_spill] sm:$0xff] }
 0x292   : > { %v1809_v34 = vadd.f32 %v5190_v25, %v1703_v6  ;;  %v1705_v61 = vmul.f32 %v5191_v17, %v1599_v5  ;;  %v5214_v35 = vsub.f32 %v5213_v19, %v4360_v36  ;;  %2566 = vmatprep.mubr.bf16.mxu0 %v1858_v9  ;;  %v5216_v8 = vsub.f32 %v5215_v53, %v4382_v1 }
 0x293   : > { %v1614_v31 = vmul.f32 %v4582_v11, %v5212_v38  ;;  %v1803_v50 = vadd.f32 %v5194_v55, %v1697_v32  ;;  %v1712_v33 = vmul.f32 %v4293_v21, %v1606_v23  ;;  %2631 = vmatprep.mubr.bf16.mxu1 %v1860_v57  ;;  %v5218_v37 = vsub.f32 %v5217_v56, %v4360_v36  ;;  %v5228_v38 = vld [vmem:[#allocation52_spill] sm:$0xff] }
 0x294   : > { %v1608_v44 = vmul.f32 %v4540_v43, %v5214_v35  ;;  %v1857_v47 = vpack.c.bf16 %v1809_v34, %v1801_v20  ;;  %v1811_v40 = vadd.f32 %v5194_v55, %v1705_v61  ;;  %v1616_v16 = vmul.f32 %v4582_v11, %v5216_v8  ;;  %v5226_v20 = vld [vmem:[#allocation50_spill] sm:$0xff]  ;;  %v5227_v34 = vld [vmem:[#allocation49_spill] sm:$0xff]  ;;  %v5229_v57 = vld [vmem:[#allocation44_spill] sm:$0xff] }
 0x295   : > { %v1720_v3 = vmul.f32 %v4293_v21, %v1614_v31  ;;  %v1818_v27 = vadd.f32 %v5180_v2, %v1712_v33  ;;  %v1605_v54 = vmul.f32 %v4540_v43, %v5218_v37  ;;  %v5220_v60 = vsub.f32 %v5219_v14, %v4382_v1  ;;  %v5230_v33 = vld [vmem:[#allocation48_spill] sm:$0xff] }
 0x296   : > { %v1714_v39 = vmul.f32 %v5181_v24, %v1608_v44  ;;  %v1859_v26 = vpack.c.bf16 %v1811_v40, %v1803_v50  ;;  %v1722_v63 = vmul.f32 %v5181_v24, %v1616_v16  ;;  %v5222_v52 = vsub.f32 %v5221_v0, %v4360_v36  ;;  %2567 = vmatmul.mubr.bf16.gmra.mxu0 %v1857_v47  ;;  %v5225_v36 = vld [vmem:[#allocation46_spill] sm:$0xff]  ;;  %v5231_v40 = vld [vmem:[#allocation47_spill] sm:$0xff] }
 0x297   : > { %v1613_v45 = vmul.f32 %v4582_v11, %v5220_v60  ;;  %v1826_v22 = vadd.f32 %v5180_v2, %v1720_v3  ;;  %v1711_v59 = vmul.f32 %v5184_v4, %v1605_v54  ;;  %v5224_v29 = vsub.f32 %v5223_v15, %v4382_v1 }
 0x298   : > { %v1607_v10 = vmul.f32 %v4540_v43, %v5222_v52  ;;  %v1820_v30 = vadd.f32 %v5187_v46, %v1714_v39  ;;  %v1828_v41 = vadd.f32 %v5187_v46, %v1722_v63  ;;  %v1542_v43 = vsub.f32 %v5225_v36, %v4420_v42  ;;  %2632 = vmatmul.mubr.bf16.gmra.mxu1 %v1859_v26 }
 0x299   : > { %v1719_v51 = vmul.f32 %v5184_v4, %v1613_v45  ;;  %v1615_v13 = vmul.f32 %v4582_v11, %v5224_v29  ;;  %v1866_v6 = vpack.c.bf16 %v1826_v22, %v1818_v27  ;;  %v1550_v32 = vsub.f32 %v5226_v20, %v4454_v48 }
 0x29a   : > { %v1713_v28 = vmul.f32 %v5191_v17, %v1607_v10  ;;  %v1868_v1 = vpack.c.bf16 %v1828_v41, %v1820_v30  ;;  %v1817_v11 = vadd.f32 %v5190_v25, %v1711_v59  ;;  %v1622_v12 = vmul.f32 %v4623_v49, %v1542_v43 }
 0x29b   : > { %v1825_v5 = vadd.f32 %v5190_v25, %v1719_v51  ;;  %v1721_v62 = vmul.f32 %v5191_v17, %v1615_v13  ;;  %2574 = vmatprep.mubr.bf16.mxu0 %v1866_v6  ;;  %v1630_v9 = vmul.f32 %v4654_v18, %v1550_v32  ;;  %v1544_v61 = vsub.f32 %v5227_v34, %v4420_v42 }
 0x29c   : > { %v1819_v58 = vadd.f32 %v5194_v55, %v1713_v28  ;;  %2639 = vmatprep.mubr.bf16.mxu1 %v1868_v1  ;;  %v1728_v7 = vmul.f32 %v4293_v21, %v1622_v12  ;;  %v1552_v31 = vsub.f32 %v5228_v38, %v4454_v48  ;;  %v1541_v50 = vsub.f32 %v5229_v57, %v4420_v42 }
 0x29d   : > { %v1827_v23 = vadd.f32 %v5194_v55, %v1721_v62  ;;  %v1549_v19 = vsub.f32 %v5230_v33, %v4454_v48  ;;  %v1865_v35 = vpack.c.bf16 %v1825_v5, %v1817_v11  ;;  %v1736_v44 = vmul.f32 %v4293_v21, %v1630_v9  ;;  %v5232_v21 = vld [vmem:[#allocation51_spill] sm:$0xff]  ;;  %v4929_v33 = vld [vmem:[%s4977_s8] ss:$0 sm:$0xff] }
 0x29e   : > { %v1624_v47 = vmul.f32 %v4623_v49, %v1544_v61  ;;  %v1543_v3 = vsub.f32 %v5231_v40, %v4420_v42  ;;  %v1834_v53 = vadd.f32 %v5180_v2, %v1728_v7  ;;  %v1632_v8 = vmul.f32 %v4654_v18, %v1552_v31 }
 0x29f   : > { %v1621_v16 = vmul.f32 %v4623_v49, %v1541_v50  ;;  %v1629_v27 = vmul.f32 %v4654_v18, %v1549_v19  ;;  %2575 = vmatmul.mubr.bf16.gmra.mxu0 %v1865_v35  ;;  %v1842_v39 = vadd.f32 %v5180_v2, %v1736_v44  ;;  %v1551_v37 = vsub.f32 %v5232_v21, %v4454_v48 }
 0x2a0   : > { %v1730_v56 = vmul.f32 %v5181_v24, %v1624_v47  ;;  %v1623_v54 = vmul.f32 %v4623_v49, %v1543_v3  ;;  %v1867_v14 = vpack.c.bf16 %v1827_v23, %v1819_v58  ;;  %v1738_v42 = vmul.f32 %v5181_v24, %v1632_v8 }
 0x2a1   : > { %v1727_v60 = vmul.f32 %v5184_v4, %v1621_v16  ;;  %v1735_v45 = vmul.f32 %v5184_v4, %v1629_v27  ;;  %v1874_v26 = vpack.c.bf16 %v1842_v39, %v1834_v53  ;;  %v1631_v22 = vmul.f32 %v4654_v18, %v1551_v37 }
 0x2a2   : > { %2640 = vmatmul.mubr.bf16.gmra.mxu1 %v1867_v14  ;;  %v1836_v2 = vadd.f32 %v5187_v46, %v1730_v56  ;;  %v1844_v63 = vadd.f32 %v5187_v46, %v1738_v42  ;;  %v1729_v48 = vmul.f32 %v5191_v17, %v1623_v54 }
 0x2a3   : > { %v1841_v0 = vadd.f32 %v5190_v25, %v1735_v45  ;;  %2582 = vmatprep.mubr.bf16.mxu0 %v1874_v26  ;;  %v1833_v49 = vadd.f32 %v5190_v25, %v1727_v60  ;;  %v1737_v24 = vmul.f32 %v5191_v17, %v1631_v22 }
 0x2a4   : > { %v1876_v52 = vpack.c.bf16 %v1844_v63, %v1836_v2  ;;  %v1835_v18 = vadd.f32 %v5194_v55, %v1729_v48 }
 0x2a5   : > { %v1873_v10 = vpack.c.bf16 %v1841_v0, %v1833_v49  ;;  %v1843_v4 = vadd.f32 %v5194_v55, %v1737_v24 }
 0x2a6   : > { %2647 = vmatprep.mubr.bf16.mxu1 %v1876_v52 }
 0x2a7   : > { %2583 = vmatmul.mubr.bf16.gmra.mxu0 %v1873_v10  ;;  %v1875_v30 = vpack.c.bf16 %v1843_v4, %v1835_v18 }
 0x2aa   : > { %2648 = vmatmul.mubr.bf16.gmra.mxu1 %v1875_v30 }
 0x325   : > { %v2969_v46 = vpop.f32.mrf.mxu0 }
 0x327   : > { %v3009_v59 = vpop.f32.mrf.mxu1  ;;  %v2970_v51 = vpop.f32.mrf.mxu0 }
 0x328   : > { %v2971_v57 = vadd.f32 %v2970_v51, %v2969_v46 }
 0x329   : > { %v3010_v15 = vpop.f32.mrf.mxu1  ;;  %v2972_v29 = vpop.f32.mrf.mxu0 }
 0x32a   : > { %v2431_v40 = vadd.f32 %v2971_v57, %v4929_v33  ;;  %v3011_v16 = vadd.f32 %v3010_v15, %v3009_v59 }
 0x32b   : > { %v3012_v13 = vpop.f32.mrf.mxu1  ;;  %v2973_v6 = vpop.f32.mrf.mxu0 }
 0x32c   : > { %v2974_v19 = vadd.f32 %v2973_v6, %v2972_v29  ;;  %v2496_v37 = vadd.f32 %v3011_v16, %v2431_v40 }
 0x32d   : > { %v3013_v25 = vpop.f32.mrf.mxu1 }
 0x32e   : > { %v2434_v53 = vadd.f32 %v2974_v19, %v4929_v33  ;;  %v3014_v56 = vadd.f32 %v3013_v25, %v3012_v13 }
 0x330   : > { %v2975_v41 = vpop.f32.mrf.mxu0  ;;  %v2499_v42 = vadd.f32 %v3014_v56, %v2434_v53 }
 0x332   : > { %v3015_v17 = vpop.f32.mrf.mxu1  ;;  %v2976_v28 = vpop.f32.mrf.mxu0 }
 0x333   : > { %v2977_v54 = vadd.f32 %v2976_v28, %v2975_v41 }
 0x334   : > { %v3016_v36 = vpop.f32.mrf.mxu1  ;;  %v2978_v43 = vpop.f32.mrf.mxu0 }
 0x335   : > { %v2439_v48 = vadd.f32 %v2977_v54, %v4929_v33  ;;  %v3017_v18 = vadd.f32 %v3016_v36, %v3015_v17 }
 0x336   : > { %v3018_v5 = vpop.f32.mrf.mxu1  ;;  %v2979_v62 = vpop.f32.mrf.mxu0 }
 0x337   : > { %v2980_v60 = vadd.f32 %v2979_v62, %v2978_v43  ;;  %v2504_v13 = vadd.f32 %v3017_v18, %v2439_v48 }
 0x338   : > { %v3019_v20 = vpop.f32.mrf.mxu1 }
 0x339   : > { %v2981_v55 = vpop.f32.mrf.mxu0  ;;  %v2442_v10 = vadd.f32 %v2980_v60, %v4929_v33  ;;  %v3020_v15 = vadd.f32 %v3019_v20, %v3018_v5 }
 0x33b   : > { %v4906_v32 = vpop.f32.mrf.mxu1  ;;  %v2982_v1 = vpop.f32.mrf.mxu0  ;;  %v2507_v28 = vadd.f32 %v3020_v15, %v2442_v10 }
 0x33c   : > { %v2983_v6 = vadd.f32 %v2982_v1, %v2981_v55 }
 0x33d   : > { %v4908_v11 = vpop.f32.mrf.mxu1  ;;  %v2984_v12 = vpop.f32.mrf.mxu0 }
 0x33e   : > { %v2447_v19 = vadd.f32 %v2983_v6, %v4929_v33  ;;  %v3023_v55 = vadd.f32 %v4908_v11, %v4906_v32 }
 0x33f   : > { %v4910_v58 = vpop.f32.mrf.mxu1  ;;  %v2985_v23 = vpop.f32.mrf.mxu0 }
 0x340   : > { %v2986_v43 = vadd.f32 %v2985_v23, %v2984_v12  ;;  %v2512_v56 = vadd.f32 %v3023_v55, %v2447_v19 }
 0x341   : > { %v4912_v9 = vpop.f32.mrf.mxu1 }
 0x342   : > { %v2450_v53 = vadd.f32 %v2986_v43, %v4929_v33 }
 0x343   : > { %v4914_v34 = vpop.f32.mrf.mxu0 }
 0x345   : > { %v4916_v61 = vpop.f32.mrf.mxu0 }
 0x346   : > { %v4918_v7 = vpop.f32.mrf.mxu1 }
 0x347   : > { %v4920_v38 = vpop.f32.mrf.mxu0 }
 0x348   : > { %v4922_v31 = vpop.f32.mrf.mxu1 }
 0x349   : > { %v4924_v50 = vpop.f32.mrf.mxu0 }
 0x34a   : > { %v4931_v35 = vpop.f32.mrf.mxu1 }
 0x34c   : > { %v4933_v47 = vpop.f32.mrf.mxu1 }
 0x34d   : > { %v3049_v44 = vpop.f32.mrf.mxu0 }
 0x34f   : > { %v3050_v3 = vpop.f32.mrf.mxu0  ;;  %v3089_v8 = vpop.f32.mrf.mxu1 }
 0x350   : > { %v3051_v27 = vadd.f32 %v3050_v3, %v3049_v44 }
 0x351   : > { %v3052_v39 = vpop.f32.mrf.mxu0  ;;  %v3090_v21 = vpop.f32.mrf.mxu1 }
 0x352   : > { %v2561_v22 = vadd.f32 %v3051_v27, %v2496_v37  ;;  %v3091_v49 = vadd.f32 %v3090_v21, %v3089_v8  ;;  %v3026_v27 = vadd.f32 %v4912_v9, %v4910_v58  ;;  %v2989_v21 = vadd.f32 %v4916_v61, %v4914_v34 }
 0x353   : > { %v3053_v14 = vpop.f32.mrf.mxu0  ;;  %v3092_v45 = vpop.f32.mrf.mxu1 }
 0x354   : > { %v3054_v26 = vadd.f32 %v3053_v14, %v3052_v39  ;;  %v2626_v30 = vadd.f32 %v3091_v49, %v2561_v22  ;;  %v2515_v14 = vadd.f32 %v3026_v27, %v2450_v53  ;;  %v2455_v58 = vadd.f32 %v2989_v21, %v4929_v33 }
 0x355   : > { %v3093_v0 = vpop.f32.mrf.mxu1 }
 0x356   : > { %v3055_v2 = vpop.f32.mrf.mxu0  ;;  %v2564_v63 = vadd.f32 %v3054_v26, %v2499_v42  ;;  %v3094_v24 = vadd.f32 %v3093_v0, %v3092_v45  ;;  %v2992_v42 = vadd.f32 %v4924_v50, %v4920_v38  ;;  %v3029_v0 = vadd.f32 %v4922_v31, %v4918_v7 }
 0x358   : > { %v3056_v52 = vpop.f32.mrf.mxu0  ;;  %v3095_v4 = vpop.f32.mrf.mxu1  ;;  %v2629_v46 = vadd.f32 %v3094_v24, %v2564_v63  ;;  %v2458_v34 = vadd.f32 %v2992_v42, %v4929_v33  ;;  %v3032_v24 = vadd.f32 %v4933_v47, %v4931_v35  ;;  %v2520_v10 = vadd.f32 %v3029_v0, %v2455_v58 }
 0x359   : > { %v3057_v59 = vadd.f32 %v3056_v52, %v3055_v2 }
 0x35a   : > { %v3058_v51 = vpop.f32.mrf.mxu0  ;;  %v3096_v29 = vpop.f32.mrf.mxu1  ;;  %v2930_v25 = vpack.c.bf16 %v2629_v46, %v2626_v30  ;;  %v2523_v30 = vadd.f32 %v3032_v24, %v2458_v34 }
 0x35b   : > { %v2569_v62 = vadd.f32 %v3057_v59, %v2504_v13  ;;  %v3097_v44 = vadd.f32 %v3096_v29, %v3095_v4 }
 0x35c   : > { %v3059_v41 = vpop.f32.mrf.mxu0  ;;  %v3098_v17 = vpop.f32.mrf.mxu1  ;;  %2931 = vst [vmem:[%s4944_s16] sm:$0xff] %v2930_v25  }
 0x35d   : > { %v3060_v36 = vadd.f32 %v3059_v41, %v3058_v51  ;;  %v2634_v1 = vadd.f32 %v3097_v44, %v2569_v62 }
 0x35e   : > { %v3099_v20 = vpop.f32.mrf.mxu1 }
 0x35f   : > { %v3061_v57 = vpop.f32.mrf.mxu0  ;;  %v2572_v5 = vadd.f32 %v3060_v36, %v2507_v28  ;;  %v3100_v40 = vadd.f32 %v3099_v20, %v3098_v17 }
 0x361   : > { %v3062_v3 = vpop.f32.mrf.mxu0  ;;  %v2637_v12 = vadd.f32 %v3100_v40, %v2572_v5 }
 0x362   : > { %v3101_v8 = vpop.f32.mrf.mxu1  ;;  %v3063_v23 = vadd.f32 %v3062_v3, %v3061_v57 }
 0x363   : > { %v3064_v16 = vpop.f32.mrf.mxu0  ;;  %v2935_v37 = vpack.c.bf16 %v2637_v12, %v2634_v1 }
 0x364   : > { %v3102_v39 = vpop.f32.mrf.mxu1  ;;  %v2577_v11 = vadd.f32 %v3063_v23, %v2512_v56 }
 0x365   : > { %v3065_v54 = vpop.f32.mrf.mxu0  ;;  %2950 = vst [vmem:[%s4944_s16 + $0x8] sm:$0xff] %v2935_v37   ;;  %v3103_v9 = vadd.f32 %v3102_v39, %v3101_v8 }
 0x366   : > { %v3104_v60 = vpop.f32.mrf.mxu1  ;;  %v3066_v32 = vadd.f32 %v3065_v54, %v3064_v16 }
 0x367   : > { %v3067_v45 = vpop.f32.mrf.mxu0  ;;  %v2642_v38 = vadd.f32 %v3103_v9, %v2577_v11 }
 0x368   : > { %v2580_v26 = vadd.f32 %v3066_v32, %v2515_v14  ;;  %v3105_v22 = vpop.f32.mrf.mxu1 }
 0x369   : > { %v3106_v2 = vadd.f32 %v3105_v22, %v3104_v60  ;;  %v3068_v63 = vpop.f32.mrf.mxu0 }
 0x36a   : > { %v3107_v61 = vpop.f32.mrf.mxu1  ;;  %v3069_v48 = vadd.f32 %v3068_v63, %v3067_v45 }
 0x36b   : > { %v2645_v50 = vadd.f32 %v3106_v2, %v2580_v26  ;;  %v3070_v49 = vpop.f32.mrf.mxu0 }
 0x36c   : > { %v3108_v52 = vpop.f32.mrf.mxu1  ;;  %v2585_v33 = vadd.f32 %v3069_v48, %v2520_v10 }
 0x36d   : > { %v2940_v4 = vpack.c.bf16 %v2645_v50, %v2642_v38  ;;  %v3071_v18 = vpop.f32.mrf.mxu0  ;;  %v3109_v7 = vadd.f32 %v3108_v52, %v3107_v61 }
 0x36e   : > { %v3110_v46 = vpop.f32.mrf.mxu1  ;;  %v3072_v59 = vadd.f32 %v3071_v18, %v3070_v49 }
 0x36f   : > { %2951 = vst [vmem:[%s4944_s16 + $0x10] sm:$0xff] %v2940_v4   ;;  %v2650_v29 = vadd.f32 %v3109_v7, %v2585_v33 }
 0x370   : > { %v2588_v51 = vadd.f32 %v3072_v59, %v2523_v30  ;;  %v3111_v15 = vpop.f32.mrf.mxu1 }
 0x371   : > { %v3112_v31 = vadd.f32 %v3111_v15, %v3110_v46 }
 0x373   : > { %v2653_v13 = vadd.f32 %v3112_v31, %v2588_v51 }
 0x375   : > { %v2945_v6 = vpack.c.bf16 %v2653_v13, %v2650_v29 }
 0x377   : > { %2952 = vst [vmem:[%s4944_s16 + $0x18] sm:$0xff] %v2945_v6  }
 0x378 PF: > { %s19_s30 = sadd.s32 1, %s3225_s30  }
 0x379   : > { %p16_p4 = scmp.ge.s32.totalorder %s19_s30, 4  }
 0x37b   :  { %18 = sbr.rel (!%p16_p4) target bundleno = 1 (0x1), region = 86 }

</bundles_post_ra>
